<compile_context>
chip_gen: v6e
topology: v6e:2x2x1
jax: 0.10.0
libtpu: 0.0.40
codegen_flags: <defaults>
</compile_context>

<pallas_src>
import functools

import jax
import jax.numpy as jnp
from jax import lax
from jax.experimental import pallas as pl
from jax.experimental.pallas import tpu as pltpu

LANE = 128


def _round_up(x, m):
    return (x + m - 1) // m * m


# ----------------------------- Pallas kernels --------------------------------


def _conv3x3_kernel(x_ref, w_ref, b_ref, o_ref):
    """Dense 3x3 conv (stride 1, pad 1) on one padded row slab.

    x_ref: (1, 1, th+2, W+2, Cin)  zero-padded NHWC row slab      (f32)
    w_ref: (9*Cin, Np)             tap-major, channel-minor weights (f32)
    b_ref: (1, Np)                 lane-padded bias                 (f32)
    o_ref: (th*W, Np)              lane-dense output rows           (f32)

    im2col is built ONCE in VMEM: the 9 shifted taps are concatenated along the
    channel/K axis and fed to a single K=9*Cin MXU matmul (f32 operands, f32
    accumulate; the offset path must stay f32 so downstream floor()/clip()
    match the reference).
    """
    _, _, thp2, wp2, cin = x_ref.shape
    th, w = thp2 - 2, wp2 - 2
    x = x_ref[...].reshape(thp2, wp2, cin)
    taps = []
    for t in range(9):                       # static unroll: 9 shifted slices
        di, dj = t // 3, t % 3
        taps.append(x[di:di + th, dj:dj + w, :])
    a = jnp.concatenate(taps, axis=-1).reshape(th * w, 9 * cin)   # (m, 9*Cin)
    o_ref[...] = (jnp.dot(a, w_ref[...], preferred_element_type=jnp.float32)
                  + b_ref[...])


def conv3x3(x, w, b, *, row_tile_target=4096):
    """3x3 conv, stride 1, padding 1, f32.

    x: (B,H,W,Cin) f32, w: (Cout,Cin,3,3), b: (Cout,).
    Returns the 128-lane-padded output (B,H,W,Np); slice channels lazily at the
    consumer so XLA fuses the channel select (no extra HBM pass).
    """
    B, H, W, Cin = x.shape
    Cout = w.shape[0]
    Np = _round_up(Cout, LANE)                       # lane-dense output stores
    # tap-major, channel-minor weight rows: row index = (di*3+dj)*Cin + c
    w9 = jnp.transpose(w, (2, 3, 1, 0)).reshape(9 * Cin, Cout)
    w9 = jnp.pad(w9, ((0, 0), (0, Np - Cout))).astype(jnp.float32)
    bp = jnp.pad(b.astype(jnp.float32), (0, Np - Cout)).reshape(1, Np)

    # Row tiling: bound the per-step f32 output block (<= ~2 MiB) so VMEM fits
    # everywhere (v7x 64 MiB total, v5e 16 MiB scoped default) and we get grid
    # steps for double-buffering / megacore.
    th = H
    while th * W > row_tile_target and th % 2 == 0:
        th //= 2
    n_rt = H // th
    if B * n_rt > 1:
        assert (th * W) % 8 == 0, "row-tile * W must be a multiple of 8"

    xp = jnp.pad(x.astype(jnp.float32), ((0, 0), (1, 1), (1, 1), (0, 0)))
    if n_rt == 1:
        xslab = xp[:, None]                                  # (B,1,H+2,W+2,Cin)
    else:
        # overlapping (th+2)-row halo slabs; tiny duplication vs the 128-lane
        # f32 output write, and keeps input/output fully auto-pipelined.
        rows = jnp.arange(n_rt)[:, None] * th + jnp.arange(th + 2)[None, :]
        xslab = xp[:, rows]                                  # (B,n_rt,th+2,W+2,Cin)

    out = pl.pallas_call(
        _conv3x3_kernel,
        out_shape=jax.ShapeDtypeStruct((B * H * W, Np), jnp.float32),
        grid=(B, n_rt),
        in_specs=[pl.BlockSpec((1, 1, th + 2, W + 2, Cin),
                               lambda i, r: (i, r, 0, 0, 0)),
                  pl.BlockSpec((9 * Cin, Np), lambda i, r: (0, 0)),
                  pl.BlockSpec((1, Np), lambda i, r: (0, 0))],
        out_specs=pl.BlockSpec((th * W, Np),
                               lambda i, r: (i * n_rt + r, 0)),
        compiler_params=pltpu.CompilerParams(
            dimension_semantics=("parallel", "parallel")),
    )(xslab, w9, bp)
    return out.reshape(B, H, W, Np)


def _matmul_bias_kernel(a_ref, w_ref, b_ref, o_ref):
    # operands arrive in bf16 (cast in the wrapper / producer), f32 accumulate
    o_ref[...] = (jnp.dot(a_ref[...], w_ref[...],
                          preferred_element_type=jnp.float32) + b_ref[...])


def _pick_row_tile(m, target):
    """Largest divisor of m that is <= target and a multiple of 8 (or == m)."""
    for t in range(min(m, target), 7, -1):
        if m % t == 0 and (t % 8 == 0 or t == m):
            return t
    return None


def matmul_bias(a, w, bias=None, *, tm_target=1024):
    """C = A @ W (+ bias).  A: (M,K) (bf16 preferred), W: (K,O) -> (M,O) f32.

    Row tile chosen as a divisor of M (no padding pass over the big A operand);
    O padded to a multiple of 128 so stores are unmasked full-lane vst.
    """
    M, K = a.shape
    O = w.shape[1]
    Np = _round_up(O, LANE)
    ap = a if a.dtype == jnp.bfloat16 else a.astype(jnp.bfloat16)
    wp = jnp.pad(w, ((0, 0), (0, Np - O))).astype(jnp.bfloat16)
    bp = (jnp.zeros((1, Np), jnp.float32) if bias is None else
          jnp.pad(bias.astype(jnp.float32), (0, Np - O)).reshape(1, Np))
    tm = _pick_row_tile(M, tm_target)
    if tm is None:                       # fallback: pad M (rare, M has no nice divisor)
        tm = min(512, _round_up(M, 8))
        Mp = _round_up(M, tm)
        ap = jnp.pad(ap, ((0, Mp - M), (0, 0)))
    else:
        Mp = M
    out = pl.pallas_call(
        _matmul_bias_kernel,
        out_shape=jax.ShapeDtypeStruct((Mp, Np), jnp.float32),
        grid=(Mp // tm,),
        in_specs=[pl.BlockSpec((tm, K), lambda i: (i, 0)),
                  pl.BlockSpec((K, Np), lambda i: (0, 0)),
                  pl.BlockSpec((1, Np), lambda i: (0, 0))],
        out_specs=pl.BlockSpec((tm, Np), lambda i: (i, 0)),
        compiler_params=pltpu.CompilerParams(dimension_semantics=("parallel",)),
    )(ap, wp, bp)
    return out[:M, :O]


# --------------------------- DeformConv2d forward -----------------------------


def deform_conv2d(x_nchw, params, *, ks=3, padding=1, modulation=False,
                  return_offset=False):
    """DeformConv2d(inc, outc, kernel_size=ks, padding, stride=1, bias=None,
    modulation) forward.  x_nchw: (B, Cin, H, W) f32 -> (B, Cout, H, W) f32."""
    x = jnp.transpose(x_nchw, (0, 2, 3, 1)).astype(jnp.float32)       # -> NHWC
    B, H, W, C = x.shape
    N = ks * ks

    # p_conv (+ m_conv when modulation) fused into ONE Pallas 3x3 conv by
    # concatenating weights along Cout -> single pass over x through HBM.
    pw, pb = params['p_w'], params['p_b']
    if modulation:
        pw = jnp.concatenate([pw, params['m_w']], axis=0)
        pb = jnp.concatenate([pb, params['m_b']], axis=0)
    head = conv3x3(x, pw, pb)                      # (B,H,W,128) lane-padded f32
    off_x = head[..., :N]                          # lazy slices -> fused by XLA
    off_y = head[..., N:2 * N]
    if modulation:
        m = jax.nn.sigmoid(head[..., 2 * N:3 * N])

    # sampling locations p = p_0 + p_n + offset (row coords first, then cols)
    xp = jnp.pad(x, ((0, 0), (padding, padding), (padding, padding), (0, 0)))
    Hp, Wp = H + 2 * padding, W + 2 * padding
    half = (ks - 1) // 2
    pn = jnp.arange(-half, half + 1, dtype=jnp.float32)
    pn_x, pn_y = jnp.repeat(pn, ks), jnp.tile(pn, ks)
    rows = jnp.arange(1, H + 1, dtype=jnp.float32)
    cols = jnp.arange(1, W + 1, dtype=jnp.float32)
    px = rows[None, :, None, None] + pn_x[None, None, None, :] + off_x
    py = cols[None, None, :, None] + pn_y[None, None, None, :] + off_y

    fx, fy = jnp.floor(px), jnp.floor(py)
    lt_x, lt_y = jnp.clip(fx, 0, Hp - 1), jnp.clip(fy, 0, Wp - 1)
    rb_x, rb_y = jnp.clip(fx + 1, 0, Hp - 1), jnp.clip(fy + 1, 0, Wp - 1)
    pxc, pyc = jnp.clip(px, 0, Hp - 1), jnp.clip(py, 0, Wp - 1)

    g_lt = (1 + (lt_x - pxc)) * (1 + (lt_y - pyc))
    g_rb = (1 - (rb_x - pxc)) * (1 - (rb_y - pyc))
    g_lb = (1 + (lt_x - pxc)) * (1 - (rb_y - pyc))
    g_rt = (1 - (rb_x - pxc)) * (1 + (lt_y - pyc))

    # TODO(synk): the data-dependent bilinear gather (per-pixel dynamic indices)
    # has no clean Pallas equivalent on TPU; it stays as jnp.take_along_axis
    # glue.  Fusing the 4-corner combine into the matmul kernel would force the
    # 4 gathered corners to materialize in HBM (4x the x_off bytes), so the
    # combine stays in XLA and only the bf16 x_off result is streamed.
    xf = xp.reshape(B, Hp * Wp, C)

    def gather(qx, qy):
        idx = (qx.astype(jnp.int32) * Wp + qy.astype(jnp.int32)).reshape(B, -1)
        g = jnp.take_along_axis(xf, idx[:, :, None], axis=1)
        return g.reshape(B, H, W, N, C)

    x_off = (g_lt[..., None] * gather(lt_x, lt_y)
             + g_rb[..., None] * gather(rb_x, rb_y)
             + g_lb[..., None] * gather(lt_x, rb_y)
             + g_rt[..., None] * gather(rb_x, lt_y))                  # (B,H,W,N,C)
    if modulation:
        x_off = x_off * m[..., None]
    # the single largest HBM intermediate: write + re-read it in bf16
    x_off = x_off.astype(jnp.bfloat16)

    # final conv(kernel=ks, stride=ks) over the tap-expanded map == per-pixel
    # matmul over N*C.  Reorder the tiny weight (row index n*C + c) instead of
    # relayouting the big activation; final conv has no bias (bias=None).
    O = params['conv_w'].shape[0]
    wmat = jnp.transpose(params['conv_w'].reshape(O, C, N), (2, 1, 0)).reshape(N * C, O)
    out = matmul_bias(x_off.reshape(B * H * W, N * C), wmat, bias=None)
    out = jnp.transpose(out.reshape(B, H, W, O), (0, 3, 1, 2))           # -> NCHW
    if return_offset:
        return out, head[..., :2 * N]
    return out


# ---------------- pure-JAX float32 references (correctness checks) ------------


def _ref_offsets(x_nchw, p_w, p_b):
    off = lax.conv_general_dilated(
        x_nchw, p_w, window_strides=(1, 1), padding=[(1, 1), (1, 1)],
        dimension_numbers=('NCHW', 'OIHW', 'NCHW'),
        precision=lax.Precision.HIGHEST)
    return off + p_b[None, :, None, None]                             # (B,2N,H,W)


def _ref_sample_and_conv(x_nchw, offset_nchw, conv_w, ks=3, padding=1):
    """PyTorch-faithful deformable sampling + final conv, NCHW, float32."""
    B, C, H, W = x_nchw.shape
    N = ks * ks
    xp = jnp.pad(x_nchw, ((0, 0), (0, 0), (padding, padding), (padding, padding)))
    Hp, Wp = H + 2 * padding, W + 2 * padding
    off = jnp.transpose(offset_nchw, (0, 2, 3, 1))                    # (B,H,W,2N)
    half = (ks - 1) // 2
    pn = jnp.arange(-half, half + 1, dtype=jnp.float32)
    pn_x, pn_y = jnp.repeat(pn, ks), jnp.tile(pn, ks)
    px = (jnp.arange(1, H + 1, dtype=jnp.float32)[None, :, None, None]
          + pn_x[None, None, None, :] + off[..., :N])
    py = (jnp.arange(1, W + 1, dtype=jnp.float32)[None, None, :, None]
          + pn_y[None, None, None, :] + off[..., N:])
    fx, fy = jnp.floor(px), jnp.floor(py)
    lt_x, lt_y = jnp.clip(fx, 0, Hp - 1), jnp.clip(fy, 0, Wp - 1)
    rb_x, rb_y = jnp.clip(fx + 1, 0, Hp - 1), jnp.clip(fy + 1, 0, Wp - 1)
    pxc, pyc = jnp.clip(px, 0, Hp - 1), jnp.clip(py, 0, Wp - 1)
    g_lt = (1 + (lt_x - pxc)) * (1 + (lt_y - pyc))
    g_rb = (1 - (rb_x - pxc)) * (1 - (rb_y - pyc))
    g_lb = (1 + (lt_x - pxc)) * (1 - (rb_y - pyc))
    g_rt = (1 - (rb_x - pxc)) * (1 + (lt_y - pyc))
    xf = xp.reshape(B, C, Hp * Wp)

    def gather(qx, qy):
        idx = (qx.astype(jnp.int32) * Wp + qy.astype(jnp.int32)).reshape(B, 1, -1)
        g = jnp.take_along_axis(xf, jnp.broadcast_to(idx, (B, C, H * W * N)), axis=2)
        return g.reshape(B, C, H, W, N)

    x_off = (g_lt[:, None] * gather(lt_x, lt_y) + g_rb[:, None] * gather(rb_x, rb_y)
             + g_lb[:, None] * gather(lt_x, rb_y) + g_rt[:, None] * gather(rb_x, lt_y))
    return jnp.einsum('ocn,bchwn->bohw', conv_w.reshape(-1, C, N), x_off,
                      precision=lax.Precision.HIGHEST)


# ----------------------------------- main -------------------------------------

if __name__ == "__main__":
    B, C, H, W = 2, 4, 16, 16            # x: (2, 4, 16, 16) NCHW
    O, KS, PAD = 4, 3, 1

    k = jax.random.split(jax.random.PRNGKey(0), 4)
    x = jax.random.normal(k[0], (B, C, H, W), jnp.float32)
    params = {
        # NOTE: PyTorch zero-inits p_conv.weight; small random weights here
        # exercise the full data-dependent sampling path (forward semantics
        # do not depend on init values).
        'p_w': 0.1 * jax.random.normal(k[1], (2 * KS * KS, C, KS, KS), jnp.float32),
        'p_b': 0.1 * jax.random.normal(k[2], (2 * KS * KS,), jnp.float32),
        'conv_w': 0.1 * jax.random.normal(k[3], (O, C, KS, KS), jnp.float32),
    }

    fwd = jax.jit(functools.partial(deform_conv2d, ks=KS, padding=PAD,
                                    modulation=False, return_offset=True))
    out, offset = fwd(x, params)
    out = jax.block_until_ready(out)

    assert out.shape == (B, O, H, W), out.shape
    assert bool(jnp.all(jnp.isfinite(out)))

    # correctness spot-checks vs pure-JAX float32 references
    off_ref = jnp.transpose(_ref_offsets(x, params['p_w'], params['p_b']),
                            (0, 2, 3, 1))
    assert float(jnp.max(jnp.abs(offset - off_ref))) < 5e-2

    out_ref = _ref_sample_and_conv(x, jnp.transpose(offset, (0, 3, 1, 2)),
                                   params['conv_w'], ks=KS, padding=PAD)
    assert float(jnp.max(jnp.abs(out - out_ref))) < 1e-1

    print("KERNEL_OK")
</pallas_src>

<mosaic_0001>
module attributes {stable_mosaic.version = 11 : i64} {
  func.func @_conv3x3_kernel(%arg0: i32, %arg1: i32, %arg2: memref<1x1x18x18x4xf32, #tpu.memory_space<vmem>>, %arg3: memref<36x128xf32, #tpu.memory_space<vmem>>, %arg4: memref<1x128xf32, #tpu.memory_space<vmem>>, %arg5: memref<256x128xf32, #tpu.memory_space<vmem>>) attributes {dimension_semantics = [#tpu.dimension_semantics<parallel>, #tpu.dimension_semantics<parallel>], iteration_bounds = array<i64: 2, 1>, scalar_prefetch = 0 : i64, scratch_operands = 0 : i64, tpu.core_type = #tpu.core_type<tc>, window_params = [{transform_indices = @transform_0, window_bounds = array<i64: 1, 1, 18, 18, 4>}, {pipeline_mode = #tpu.pipeline_mode<synchronous>, transform_indices = @transform_1, window_bounds = array<i64: 36, 128>}, {pipeline_mode = #tpu.pipeline_mode<synchronous>, transform_indices = @transform_2, window_bounds = array<i64: 1, 128>}, {transform_indices = @transform_3, window_bounds = array<i64: 256, 128>}]} {
    %c0 = arith.constant 0 : index
    %c0_0 = arith.constant 0 : index
    %c0_1 = arith.constant 0 : index
    %c0_2 = arith.constant 0 : index
    %c0_3 = arith.constant 0 : index
    %0 = vector.load %arg2[%c0, %c0_0, %c0_1, %c0_2, %c0_3] : memref<1x1x18x18x4xf32, #tpu.memory_space<vmem>>, vector<1x1x18x18x4xf32>
    %1 = vector.shape_cast %0 : vector<1x1x18x18x4xf32> to vector<18x18x4xf32>
    %2 = vector.extract_strided_slice %1 {offsets = [0, 0, 0], sizes = [16, 16, 4], strides = [1, 1, 1]} : vector<18x18x4xf32> to vector<16x16x4xf32>
    %3 = vector.extract_strided_slice %1 {offsets = [0, 1, 0], sizes = [16, 16, 4], strides = [1, 1, 1]} : vector<18x18x4xf32> to vector<16x16x4xf32>
    %4 = vector.extract_strided_slice %1 {offsets = [0, 2, 0], sizes = [16, 16, 4], strides = [1, 1, 1]} : vector<18x18x4xf32> to vector<16x16x4xf32>
    %5 = vector.extract_strided_slice %1 {offsets = [1, 0, 0], sizes = [16, 16, 4], strides = [1, 1, 1]} : vector<18x18x4xf32> to vector<16x16x4xf32>
    %6 = vector.extract_strided_slice %1 {offsets = [1, 1, 0], sizes = [16, 16, 4], strides = [1, 1, 1]} : vector<18x18x4xf32> to vector<16x16x4xf32>
    %7 = vector.extract_strided_slice %1 {offsets = [1, 2, 0], sizes = [16, 16, 4], strides = [1, 1, 1]} : vector<18x18x4xf32> to vector<16x16x4xf32>
    %8 = vector.extract_strided_slice %1 {offsets = [2, 0, 0], sizes = [16, 16, 4], strides = [1, 1, 1]} : vector<18x18x4xf32> to vector<16x16x4xf32>
    %9 = vector.extract_strided_slice %1 {offsets = [2, 1, 0], sizes = [16, 16, 4], strides = [1, 1, 1]} : vector<18x18x4xf32> to vector<16x16x4xf32>
    %10 = vector.extract_strided_slice %1 {offsets = [2, 2, 0], sizes = [16, 16, 4], strides = [1, 1, 1]} : vector<18x18x4xf32> to vector<16x16x4xf32>
    %11 = tpu.concatenate %2, %3, %4, %5, %6, %7, %8, %9, %10 in 2 : vector<16x16x4xf32>, vector<16x16x4xf32>, vector<16x16x4xf32>, vector<16x16x4xf32>, vector<16x16x4xf32>, vector<16x16x4xf32>, vector<16x16x4xf32>, vector<16x16x4xf32>, vector<16x16x4xf32> -> vector<16x16x36xf32>
    %12 = vector.shape_cast %11 : vector<16x16x36xf32> to vector<256x36xf32>
    %c0_4 = arith.constant 0 : index
    %c0_5 = arith.constant 0 : index
    %13 = vector.load %arg3[%c0_4, %c0_5] : memref<36x128xf32, #tpu.memory_space<vmem>>, vector<36x128xf32>
    %cst = arith.constant dense<0.000000e+00> : vector<256x128xf32>
    %14 = tpu.matmul %12, %13, %cst {dimension_numbers = #tpu.dot_dimension_numbers<[1], [0], [0], [1], [0, 0, 1, 1], [], []>} : vector<256x36xf32>, vector<36x128xf32>, vector<256x128xf32> -> vector<256x128xf32>
    %c0_6 = arith.constant 0 : index
    %c0_7 = arith.constant 0 : index
    %15 = vector.load %arg4[%c0_6, %c0_7] : memref<1x128xf32, #tpu.memory_space<vmem>>, vector<1x128xf32>
    %16 = vector.broadcast %15 : vector<1x128xf32> to vector<256x128xf32>
    %17 = arith.addf %14, %16 : vector<256x128xf32>
    %c0_8 = arith.constant 0 : index
    %c0_9 = arith.constant 0 : index
    %18 = vector.load %arg5[%c0_8, %c0_9] : memref<256x128xf32, #tpu.memory_space<vmem>>, vector<256x128xf32>
    tpu.vector_store %arg5[%c0_8, %c0_9], %17 {strides = array<i32>} : memref<256x128xf32, #tpu.memory_space<vmem>>, vector<256x128xf32>,
    return
  }
  func.func @transform_0(%arg0: i32, %arg1: i32) -> (i32, i32, i32, i32, i32) {
    %c0_i32 = arith.constant 0 : i32
    %c0_i32_0 = arith.constant 0 : i32
    %c0_i32_1 = arith.constant 0 : i32
    %c0_i32_2 = arith.constant 0 : i32
    return %arg0, %arg1, %c0_i32, %c0_i32_0, %c0_i32_1 : i32, i32, i32, i32, i32
  }
  func.func @transform_1(%arg0: i32, %arg1: i32) -> (i32, i32) {
    %c0_i32 = arith.constant 0 : i32
    %c0_i32_0 = arith.constant 0 : i32
    %c0_i32_1 = arith.constant 0 : i32
    return %c0_i32, %c0_i32_0 : i32, i32
  }
  func.func @transform_2(%arg0: i32, %arg1: i32) -> (i32, i32) {
    %c0_i32 = arith.constant 0 : i32
    %c0_i32_0 = arith.constant 0 : i32
    %c0_i32_1 = arith.constant 0 : i32
    return %c0_i32, %c0_i32_0 : i32, i32
  }
  func.func @transform_3(%arg0: i32, %arg1: i32) -> (i32, i32) {
    %c1_i32 = arith.constant 1 : i32
    %0 = arith.muli %arg0, %c1_i32 : i32
    %1 = arith.addi %0, %arg1 : i32
    %c0_i32 = arith.constant 0 : i32
    %c0_i32_0 = arith.constant 0 : i32
    return %1, %c0_i32 : i32, i32
  }
}

module attributes {stable_mosaic.version = 11 : i64} {
  func.func @_matmul_bias_kernel(%arg0: i32, %arg1: memref<512x36xbf16, #tpu.memory_space<vmem>>, %arg2: memref<36x128xbf16, #tpu.memory_space<vmem>>, %arg3: memref<1x128xf32, #tpu.memory_space<vmem>>, %arg4: memref<512x128xf32, #tpu.memory_space<vmem>>) attributes {dimension_semantics = [#tpu.dimension_semantics<parallel>], iteration_bounds = array<i64: 1>, scalar_prefetch = 0 : i64, scratch_operands = 0 : i64, tpu.core_type = #tpu.core_type<tc>, window_params = [{transform_indices = @transform_0, window_bounds = array<i64: 512, 36>}, {pipeline_mode = #tpu.pipeline_mode<synchronous>, transform_indices = @transform_1, window_bounds = array<i64: 36, 128>}, {pipeline_mode = #tpu.pipeline_mode<synchronous>, transform_indices = @transform_2, window_bounds = array<i64: 1, 128>}, {transform_indices = @transform_3, window_bounds = array<i64: 512, 128>}]} {
    %c0 = arith.constant 0 : index
    %c0_0 = arith.constant 0 : index
    %0 = vector.load %arg1[%c0, %c0_0] : memref<512x36xbf16, #tpu.memory_space<vmem>>, vector<512x36xbf16>
    %c0_1 = arith.constant 0 : index
    %c0_2 = arith.constant 0 : index
    %1 = vector.load %arg2[%c0_1, %c0_2] : memref<36x128xbf16, #tpu.memory_space<vmem>>, vector<36x128xbf16>
    %cst = arith.constant dense<0.000000e+00> : vector<512x128xf32>
    %2 = tpu.matmul %0, %1, %cst {dimension_numbers = #tpu.dot_dimension_numbers<[1], [0], [0], [1], [0, 0, 1, 1], [], []>} : vector<512x36xbf16>, vector<36x128xbf16>, vector<512x128xf32> -> vector<512x128xf32>
    %c0_3 = arith.constant 0 : index
    %c0_4 = arith.constant 0 : index
    %3 = vector.load %arg3[%c0_3, %c0_4] : memref<1x128xf32, #tpu.memory_space<vmem>>, vector<1x128xf32>
    %4 = vector.broadcast %3 : vector<1x128xf32> to vector<512x128xf32>
    %5 = arith.addf %2, %4 : vector<512x128xf32>
    %c0_5 = arith.constant 0 : index
    %c0_6 = arith.constant 0 : index
    %6 = vector.load %arg4[%c0_5, %c0_6] : memref<512x128xf32, #tpu.memory_space<vmem>>, vector<512x128xf32>
    tpu.vector_store %arg4[%c0_5, %c0_6], %5 {strides = array<i32>} : memref<512x128xf32, #tpu.memory_space<vmem>>, vector<512x128xf32>,
    return
  }
  func.func @transform_0(%arg0: i32) -> (i32, i32) {
    %c0_i32 = arith.constant 0 : i32
    %c0_i32_0 = arith.constant 0 : i32
    return %arg0, %c0_i32 : i32, i32
  }
  func.func @transform_1(%arg0: i32) -> (i32, i32) {
    %c0_i32 = arith.constant 0 : i32
    %c0_i32_0 = arith.constant 0 : i32
    %c0_i32_1 = arith.constant 0 : i32
    return %c0_i32, %c0_i32_0 : i32, i32
  }
  func.func @transform_2(%arg0: i32) -> (i32, i32) {
    %c0_i32 = arith.constant 0 : i32
    %c0_i32_0 = arith.constant 0 : i32
    %c0_i32_1 = arith.constant 0 : i32
    return %c0_i32, %c0_i32_0 : i32, i32
  }
  func.func @transform_3(%arg0: i32) -> (i32, i32) {
    %c0_i32 = arith.constant 0 : i32
    %c0_i32_0 = arith.constant 0 : i32
    return %arg0, %c0_i32 : i32, i32
  }
}

</mosaic_0001>

<bundles_post_ra>
// kernel: tile.8
= control target key start
LH: loop header
LB: loop body
LE: loop exit
PB: predicated region body
PF: predicated region fallthrough
CT: control target
= control target key end

     0   :  { %s22_s0 = inlined_call_operand.vmem [shape: f32[3], index: 0, kind: input, shape index: {}]   ;;  %s23_s1 = inlined_call_operand.vmem [shape: f32[3,3], index: 1, kind: output, shape index: {}]  }
   0x1   :  { %v4_v0 = vld [vmem:[%s22_s0] ss:$0 sm:$0xff] }
   0x2   :  { %5 = vst [vmem:[%s23_s1] sm:$0xf] %v4_v0 }

// kernel: deform_conv2d.2
= control target key start
LH: loop header
LB: loop body
LE: loop exit
PB: predicated region body
PF: predicated region fallthrough
CT: control target
= control target key end

     0   :  { %s2226_s12 = smov 0   ;;  %s2228_s13 = smov 0   ;;  %s4014_s0 = inlined_call_operand.vmem [shape: f32[2,1,18,18,4], index: 0, kind: input, shape index: {}]   ;;  %s4015_s1 = inlined_call_operand.vmem [shape: f32[36,128], index: 1, kind: input, shape index: {}]   ;;  %s4016_s2 = inlined_call_operand.vmem [shape: f32[1,128], index: 2, kind: input, shape index: {}]   ;;  %s4017_s3 = inlined_call_operand.vmem [shape: f32[512,128], index: 3, kind: output, shape index: {}]  }
   0x1   :  { %s2230_s14 = smov 0  }
   0x2 LB: > { %s25_s15 = sadd.s32 1, %s2192_s13  ;;  %p1976_p0 = scmp.ge.s32.totalorder %s2196_s14, 1  ;;  %s2196_s14 = sphi %s2230_s14, %s13_s14   ;;  %s2192_s13 = sphi %s2228_s13, %s4299_s13   ;;  %s2188_s12 = sphi %s2226_s12, %s4298_s12  }
   0x3   : > { %p27_p1 = scmp.ge.s32.totalorder %s25_s15, 2  ;;  %p157_p2 = scmp.lt.s32.totalorder %s2196_s14, 3 }
   0x5   : > { %s4301_s15 = smov (%p27_p1, %s25_s15), 0  ;;  %p158_p3 = pnand %p1976_p0, %p157_p2 }
   0x7   : > { %161 = sbr.rel (%p158_p3) target bundleno = 846 (0x34e), region = 32 }
   0xc   : > { %p186_p4 = scmp.lt.s32.totalorder %s2188_s12, 1  ;;  %vm305_vm0 = vcmask 1046528   ;;  %s2198_s21 = smov 4   ;;  %vm482_vm1 = vcmask 1045504   ;;  %vm1261_vm2 = vcmask 31744   ;;  %vm1294_vm3 = vcmask 64512  }
   0xd   : > { %s2199_s22 = smov 8   ;;  %s2200_s23 = smov 12   ;;  %vm1634_vm4 = vcmask 1043456   ;;  %vm1327_vm5 = vcmask 97280   ;;  %vm1360_vm6 = vcmask 130048   ;;  %vm1393_vm7 = vcmask 162816  }
   0xe   : > { %s187_s16 = scalar_select %p186_p4, %s2188_s12, 1  ;;  %vm1426_vm8 = vcmask 195584   ;;  %vm1459_vm9 = vcmask 228352   ;;  %vm1492_vm10 = vcmask 261120   ;;  %vm1537_vm11 = vcmask 293888  }
   0xf   : > { %s2201_s24 = smov 16   ;;  %s2202_s25 = smov 20  }
  0x10   : > { %s2121_s17 = smul.u32 432, %s187_s16  ;;  %s2203_s26 = smov 24  }
  0x11   : > { %s2204_s4 = smov 28   ;;  %s2205_s11 = smov 32  }
  0x12   : > { %s2251_s20 = scalar_lea.vmem %s4014_s0, %s2121_s17  ;;  %s1978_s16 = sshll.u32 %s2188_s12, 5 }
  0x13   : > { %v2254_v0 = vld [vmem:[%s2251_s20 + $0x18] sm:$0xff]  ;;  %v2257_v1 = vld [vmem:[%s2251_s20 + $0x20] sm:$0xff]  ;;  %v2265_v5 = vld [vmem:[%s2251_s20 + $0x8] sm:$0xff]  ;;  %p197_p5 = scmp.lt.s32.totalorder %s1978_s16, 63 }
  0x14   : > { %v2260_v2 = vld [vmem:[%s2251_s20] sm:$0xff]  ;;  %v311_v3 = vrot.slane %v2254_v0, 1  ;;  %v312_v4 = vrot.slane %v2257_v1, 1  ;;  %v2269_v7 = vld [vmem:[%s2251_s20 + $0x28] sm:$0x3]  ;;  %v307_v8 = vrot.slane %v2265_v5, 1 }
  0x15   : > { %v306_v6 = vrot.slane %v2260_v2, 1  ;;  %v314_v9 = vrot.slane %v2269_v7, 1  ;;  %v2274_v10 = vld [vmem:[%s2251_s20 + $0x10] sm:$0x3]  ;;  %v2277_v11 = vld [vmem:[%s2251_s20 + $0x38] sm:$0xff]  ;;  %v2307_v24 = vld [vmem:[%s2251_s20 + $0x48] sm:$0xff] }
  0x16   : > { %4126 = vst [vmem:[#allocation2_spill] sm:$0xff] %v2277_v11  ;;  %v2280_v12 = vsel %vm305_vm0, %v311_v3, %v312_v4  ;;  %v309_v13 = vrot.slane %v2274_v10, 1  ;;  %v2284_v14 = vld [vmem:[%s2251_s20 + $0x40] sm:$0x3]  ;;  %v2287_v15 = vld [vmem:[%s2251_s20 + $0x30] sm:$0xff]  ;;  %v317_v18 = vrot.slane %v2277_v11, 1 }
  0x17   : > { %390 = vrot.lane.b32.xlu1 %v2280_v12, %s2198_s21  ;;  %v308_v16 = vsel %vm305_vm0, %v306_v6, %v307_v8  ;;  %v2294_v17 = vsel %vm305_vm0, %v312_v4, %v314_v9  ;;  %v319_v19 = vrot.slane %v2284_v14, 1  ;;  %v316_v21 = vrot.slane %v2287_v15, 1  ;;  %v2301_v22 = vld [vmem:[%s2251_s20 + $0x50] sm:$0xff]  ;;  %v2304_v23 = vld [vmem:[%s2251_s20 + $0x58] sm:$0x3]  ;;  %v2322_v30 = vld [vmem:[%s2251_s20 + $0x68] sm:$0xff] }
  0x18   : > { %386 = vrot.lane.b32.xlu0 %v308_v16, %s2198_s21  ;;  %v310_v20 = vsel %vm305_vm0, %v307_v8, %v309_v13  ;;  %v322_v26 = vrot.slane %v2301_v22, 1  ;;  %v324_v27 = vrot.slane %v2304_v23, 1  ;;  %v321_v29 = vrot.slane %v2307_v24, 1  ;;  %v2325_v31 = vld [vmem:[%s2251_s20 + $0x70] sm:$0x3]  ;;  %v2328_v32 = vld [vmem:[%s2251_s20 + $0x60] sm:$0xff] }
  0x19   : > { %v2313_v25 = vsel %vm305_vm0, %v317_v18, %v319_v19  ;;  %v2318_v28 = vsel %vm305_vm0, %v316_v21, %v317_v18  ;;  %v327_v34 = vrot.slane %v2322_v30, 1  ;;  %v329_v35 = vrot.slane %v2325_v31, 1  ;;  %v2344_v38 = vld [vmem:[%s2251_s20 + $0x80] sm:$0xff]  ;;  %v2347_v39 = vld [vmem:[%s2251_s20 + $0x88] sm:$0x3]  ;;  %v2350_v40 = vld [vmem:[%s2251_s20 + $0x78] sm:$0xff] }
  0x1a   : > { %v2335_v33 = vsel %vm305_vm0, %v322_v26, %v324_v27  ;;  %v2340_v36 = vsel %vm305_vm0, %v321_v29, %v322_v26  ;;  %v326_v37 = vrot.slane %v2328_v32, 1  ;;  %v332_v42 = vrot.slane %v2344_v38, 1  ;;  %v2366_v46 = vld [vmem:[%s2251_s20 + $0x98] sm:$0xff]  ;;  %v2369_v47 = vld [vmem:[%s2251_s20 + $0xa0] sm:$0x3]  ;;  %v2372_v48 = vld [vmem:[%s2251_s20 + $0x90] sm:$0xff] }
  0x1b   : > { %392 = vrot.lane.b32.xlu1 %v2294_v17, %s2198_s21  ;;  %4127 = vst [vmem:[#allocation3_spill] sm:$0xff] %v2340_v36  ;;  %v2357_v41 = vsel %vm305_vm0, %v327_v34, %v329_v35  ;;  %v334_v43 = vrot.slane %v2347_v39, 1  ;;  %v331_v45 = vrot.slane %v2350_v40, 1  ;;  %v337_v50 = vrot.slane %v2366_v46, 1  ;;  %v2388_v54 = vld [vmem:[%s2251_s20 + $0xb0] sm:$0xff]  ;;  %v2394_v56 = vld [vmem:[%s2251_s20 + $0xa8] sm:$0xff] }
  0x1c   : > { %388 = vrot.lane.b32.xlu0 %v310_v20, %s2198_s21  ;;  %4128 = vst [vmem:[#allocation4_spill] sm:$0xff] %v2357_v41  ;;  %v2362_v44 = vsel %vm305_vm0, %v326_v37, %v327_v34  ;;  %v339_v51 = vrot.slane %v2369_v47, 1  ;;  %v336_v53 = vrot.slane %v2372_v48, 1  ;;  %v2391_v55 = vld [vmem:[%s2251_s20 + $0xb8] sm:$0x3]  ;;  %v342_v58 = vrot.slane %v2388_v54, 1 }
  0x1d   : > { %4129 = vst [vmem:[#allocation5_spill] sm:$0xff] %v2362_v44  ;;  %v2379_v49 = vsel %vm305_vm0, %v332_v42, %v334_v43  ;;  %v2384_v52 = vsel %vm305_vm0, %v331_v45, %v332_v42  ;;  %v344_v59 = vrot.slane %v2391_v55, 1  ;;  %v341_v61 = vrot.slane %v2394_v56, 1  ;;  %v2410_v62 = vld [vmem:[%s2251_s20 + $0xc8] sm:$0xff]  ;;  %v2413_v63 = vld [vmem:[%s2251_s20 + $0xd0] sm:$0x3] }
  0x1e   : > { %4130 = vst [vmem:[#allocation6_spill] sm:$0xff] %v2379_v49  ;;  %4131 = vst [vmem:[#allocation7_spill] sm:$0xff] %v2384_v52  ;;  %v2401_v57 = vsel %vm305_vm0, %v337_v50, %v339_v51  ;;  %v2406_v60 = vsel %vm305_vm0, %v336_v53, %v337_v50  ;;  %v2416_v3 = vld [vmem:[%s2251_s20 + $0xc0] sm:$0xff]  ;;  %v347_v6 = vrot.slane %v2410_v62, 1  ;;  %v349_v8 = vrot.slane %v2413_v63, 1  ;;  %v2438_v19 = vld [vmem:[%s2251_s20 + $0xd8] sm:$0xff] }
  0x1f   : > { %396 = vrot.lane.b32.xlu1 %v2313_v25, %s2198_s21  ;;  %4132 = vst [vmem:[#allocation8_spill] sm:$0xff] %v2401_v57  ;;  %4133 = vst [vmem:[#allocation9_spill] sm:$0xff] %v2406_v60  ;;  %v2423_v4 = vsel %vm305_vm0, %v342_v58, %v344_v59  ;;  %v2428_v9 = vsel %vm305_vm0, %v341_v61, %v342_v58  ;;  %v346_v13 = vrot.slane %v2416_v3, 1  ;;  %v2432_v16 = vld [vmem:[%s2251_s20 + $0xe0] sm:$0xff]  ;;  %v2435_v18 = vld [vmem:[%s2251_s20 + $0xe8] sm:$0x3] }
  0x20   : > { %394 = vrot.lane.b32.xlu0 %v2318_v28, %s2198_s21  ;;  %4134 = vst [vmem:[#allocation10_spill] sm:$0xff] %v2423_v4  ;;  %4135 = vst [vmem:[#allocation11_spill] sm:$0xff] %v2428_v9  ;;  %v2445_v20 = vsel %vm305_vm0, %v347_v6, %v349_v8  ;;  %v352_v21 = vrot.slane %v2432_v16, 1  ;;  %v354_v26 = vrot.slane %v2435_v18, 1  ;;  %v351_v29 = vrot.slane %v2438_v19, 1  ;;  %v2454_v34 = vld [vmem:[%s2251_s20 + $0xf8] sm:$0xff] }
  0x21   : > { %4136 = vst [vmem:[#allocation12_spill] sm:$0xff] %v2445_v20  ;;  %v2450_v27 = vsel %vm305_vm0, %v346_v13, %v347_v6  ;;  %v2457_v35 = vld [vmem:[%s2251_s20 + $0x100] sm:$0x3]  ;;  %v2460_v37 = vld [vmem:[%s2251_s20 + $0xf0] sm:$0xff]  ;;  %v357_v43 = vrot.slane %v2454_v34, 1  ;;  %v2482_v59 = vld [vmem:[%s2251_s20 + $0x108] sm:$0xff] }
  0x22   : > { %4137 = vst [vmem:[#allocation13_spill] sm:$0xff] %v2450_v27  ;;  %v2467_v42 = vsel %vm305_vm0, %v352_v21, %v354_v26  ;;  %v359_v45 = vrot.slane %v2457_v35, 1  ;;  %v2472_v50 = vsel %vm305_vm0, %v351_v29, %v352_v21  ;;  %v356_v51 = vrot.slane %v2460_v37, 1  ;;  %v2476_v53 = vld [vmem:[%s2251_s20 + $0x110] sm:$0xff]  ;;  %v2479_v58 = vld [vmem:[%s2251_s20 + $0x118] sm:$0x3] }
  0x23   : > { %400 = vrot.lane.b32.xlu1 %v2335_v33, %s2198_s21  ;;  %4138 = vst [vmem:[#allocation14_spill] sm:$0xff] %v2467_v42  ;;  %4139 = vst [vmem:[#allocation15_spill] sm:$0xff] %v2472_v50  ;;  %v362_v6 = vrot.slane %v2476_v53, 1  ;;  %v364_v8 = vrot.slane %v2479_v58, 1  ;;  %v361_v21 = vrot.slane %v2482_v59, 1  ;;  %v2498_v26 = vld [vmem:[%s2251_s20 + $0x128] sm:$0xff] }
  0x24   : > { %398 = vrot.lane.b32.xlu0 %v2340_v36, %s2198_s21  ;;  %v2489_v61 = vsel %vm305_vm0, %v357_v43, %v359_v45  ;;  %v2494_v13 = vsel %vm305_vm0, %v356_v51, %v357_v43  ;;  %v2501_v29 = vld [vmem:[%s2251_s20 + $0x130] sm:$0x3]  ;;  %v367_v43 = vrot.slane %v2498_v26, 1  ;;  %s4303_s16 = smov (!%p197_p5, %s1978_s16), 63 }
  0x25   : > { %4140 = vst [vmem:[#allocation16_spill] sm:$0xff] %v2489_v61  ;;  %4141 = vst [vmem:[#allocation17_spill] sm:$0xff] %v2494_v13  ;;  %v2511_v45 = vsel %vm305_vm0, %v362_v6, %v364_v8  ;;  %v369_v51 = vrot.slane %v2501_v29, 1  ;;  %s1979_s17 = sshll.u32 %s4303_s16, 3 }
  0x26   : > { %4142 = vst [vmem:[#allocation18_spill] sm:$0xff] %v2511_v45 }
  0x27   : > { %404 = vrot.lane.b32.xlu1 %v2357_v41, %s2198_s21  ;;  %v2533_v8 = vsel %vm305_vm0, %v367_v43, %v369_v51 }
  0x28   : > { %402 = vrot.lane.b32.xlu0 %v2362_v44, %s2198_s21  ;;  %4144 = vst [vmem:[#allocation20_spill] sm:$0xff] %v2533_v8  ;;  %v2567_v44 = vld [vmem:[%s2251_s20 + $0x178] sm:$0x3] }
  0x2b   : > { %408 = vrot.lane.b32.xlu1 %v2379_v49, %s2198_s21  ;;  %v2564_v49 = vld [vmem:[%s2251_s20 + $0x170] sm:$0xff] }
  0x2c   : > { %406 = vrot.lane.b32.xlu0 %v2384_v52, %s2198_s21 }
  0x2f   : > { %412 = vrot.lane.b32.xlu1 %v2401_v57, %s2198_s21 }
  0x30   : > { %410 = vrot.lane.b32.xlu0 %v2406_v60, %s2198_s21  ;;  %v2542_v60 = vld [vmem:[%s2251_s20 + $0x158] sm:$0xff] }
  0x33   : > { %416 = vrot.lane.b32.xlu1 %v2423_v4, %s2198_s21 }
  0x34   : > { %414 = vrot.lane.b32.xlu0 %v2428_v9, %s2198_s21 }
  0x37   : > { %420 = vrot.lane.b32.xlu1 %v2445_v20, %s2198_s21  ;;  %v2520_v20 = vld [vmem:[%s2251_s20 + $0x140] sm:$0xff] }
  0x38   : > { %418 = vrot.lane.b32.xlu0 %v2450_v27, %s2198_s21 }
  0x3b   : > { %424 = vrot.lane.b32.xlu1 %v2467_v42, %s2198_s21  ;;  %v2516_v42 = vsel %vm305_vm0, %v361_v21, %v362_v6  ;;  %v372_v6 = vrot.slane %v2520_v20, 1 }
  0x3c   : > { %422 = vrot.lane.b32.xlu0 %v2472_v50, %s2198_s21  ;;  %v2504_v50 = vld [vmem:[%s2251_s20 + $0x120] sm:$0xff]  ;;  %4143 = vst [vmem:[#allocation19_spill] sm:$0xff] %v2516_v42 }
  0x3d   : > { %v366_v27 = vrot.slane %v2504_v50, 1 }
  0x3f   : > { %428 = vrot.lane.b32.xlu1 %v2489_v61, %s2198_s21  ;;  %v2523_v61 = vld [vmem:[%s2251_s20 + $0x148] sm:$0x3]  ;;  %v2538_v9 = vsel %vm305_vm0, %v366_v27, %v367_v43  ;;  %v377_v27 = vrot.slane %v2542_v60, 1 }
  0x40   : > { %426 = vrot.lane.b32.xlu0 %v2494_v13, %s2198_s21  ;;  %v2526_v13 = vld [vmem:[%s2251_s20 + $0x138] sm:$0xff]  ;;  %v374_v21 = vrot.slane %v2523_v61, 1  ;;  %4145 = vst [vmem:[#allocation21_spill] sm:$0xff] %v2538_v9 }
  0x41   : > { %v371_v4 = vrot.slane %v2526_v13, 1 }
  0x42   : > { %v2555_v51 = vsel %vm305_vm0, %v372_v6, %v374_v21 }
  0x43   : > { %432 = vrot.lane.b32.xlu1 %v2511_v45, %s2198_s21  ;;  %v2545_v45 = vld [vmem:[%s2251_s20 + $0x160] sm:$0x3]  ;;  %4146 = vst [vmem:[#allocation22_spill] sm:$0xff] %v2555_v51  ;;  %v2560_v57 = vsel %vm305_vm0, %v371_v4, %v372_v6  ;;  %v382_v4 = vrot.slane %v2564_v49, 1  ;;  %v384_v6 = vrot.slane %v2567_v44, 1 }
  0x44   : > { %430 = vrot.lane.b32.xlu0 %v2516_v42, %s2198_s21  ;;  %v2548_v42 = vld [vmem:[%s2251_s20 + $0x150] sm:$0xff]  ;;  %v379_v43 = vrot.slane %v2545_v45, 1  ;;  %4147 = vst [vmem:[#allocation23_spill] sm:$0xff] %v2560_v57 }
  0x45   : > { %v376_v52 = vrot.slane %v2548_v42, 1 }
  0x46   : > { %v2577_v21 = vsel %vm305_vm0, %v377_v27, %v379_v43  ;;  %v484_v43 = vrot.slane %v2265_v5, 2  ;;  %v491_v5 = vrot.slane %v2269_v7, 2  ;;  %v493_v7 = vrot.slane %v2287_v15, 2 }
  0x47   : > { %436 = vrot.lane.b32.xlu1 %v2533_v8, %s2198_s21  ;;  %v2570_v8 = vld [vmem:[%s2251_s20 + $0x168] sm:$0xff]  ;;  %4149 = vst [vmem:[#allocation25_spill] sm:$0xff] %v2577_v21 }
  0x48   : > { %434 = vrot.lane.b32.xlu0 %v2538_v9, %s2198_s21  ;;  %4148 = vst [vmem:[#allocation24_spill] sm:$0xff] %v2570_v8  ;;  %v2582_v9 = vsel %vm305_vm0, %v376_v52, %v377_v27  ;;  %v381_v41 = vrot.slane %v2570_v8, 1  ;;  %v483_v52 = vrot.slane %v2260_v2, 2 }
  0x49   : > { %4150 = vst [vmem:[#allocation26_spill] sm:$0xff] %v2582_v9 }
  0x4a   : > { %v2595_v36 = vsel %vm305_vm0, %v381_v41, %v382_v4  ;;  %v488_v41 = vrot.slane %v2254_v0, 2 }
  0x4b   : > { %440 = vrot.lane.b32.xlu1 %v2555_v51, %s2198_s21  ;;  %v2590_v51 = vsel %vm305_vm0, %v382_v4, %v384_v6  ;;  %4152 = vst [vmem:[#allocation28_spill] sm:$0xff] %v2595_v36  ;;  %v489_v6 = vrot.slane %v2257_v1, 2  ;;  %v494_v4 = vrot.slane %v2277_v11, 2 }
  0x4c   : > { %438 = vrot.lane.b32.xlu0 %v2560_v57, %s2198_s21  ;;  %4151 = vst [vmem:[#allocation27_spill] sm:$0xff] %v2590_v51  ;;  %v486_v57 = vrot.slane %v2274_v10, 2  ;;  %v485_v10 = vsel %vm482_vm1, %v483_v52, %v484_v43  ;;  %v499_v52 = vrot.slane %v2301_v22, 2 }
  0x4d   : > { %v2610_v2 = vsel %vm482_vm1, %v489_v6, %v491_v5 }
  0x4e   : > { %v487_v27 = vsel %vm482_vm1, %v484_v43, %v486_v57  ;;  %v496_v57 = vrot.slane %v2284_v14, 2  ;;  %v2628_v14 = vsel %vm482_vm1, %v493_v7, %v494_v4  ;;  %v509_v7 = vrot.slane %v2344_v38, 2 }
  0x4f   : > { %444 = vrot.lane.b32.xlu1 %v2577_v21, %s2198_s21  ;;  %4154 = vst [vmem:[#allocation30_spill] sm:$0xff] %v2628_v14  ;;  %v521_v21 = vrot.slane %v2391_v55, 2 }
  0x50   : > { %442 = vrot.lane.b32.xlu0 %v2582_v9, %s2198_s21  ;;  %v2623_v43 = vsel %vm482_vm1, %v494_v4, %v496_v57  ;;  %v503_v4 = vrot.slane %v2328_v32, 2  ;;  %v526_v9 = vrot.slane %v2413_v63, 2 }
  0x51   : > { %4153 = vst [vmem:[#allocation29_spill] sm:$0xff] %v2623_v43 }
  0x53   : > { %448 = vrot.lane.b32.xlu1 %v2590_v51, %s2198_s21  ;;  %v2615_v51 = vsel %vm482_vm1, %v488_v41, %v489_v6  ;;  %v498_v6 = vrot.slane %v2307_v24, 2  ;;  %v506_v41 = vrot.slane %v2325_v31, 2 }
  0x54   : > { %446 = vrot.lane.b32.xlu0 %v2595_v36, %s2198_s21  ;;  %v516_v36 = vrot.slane %v2369_v47, 2  ;;  %s3877_s21 = scalar_lea.vmem %s4017_s3, %s1979_s17 }
  0x57   : > { %565 = vrot.lane.b32.xlu1 %v487_v27, %s2199_s22  ;;  %v501_v27 = vrot.slane %v2304_v23, 2  ;;  %v2641_v23 = vsel %vm482_vm1, %v498_v6, %v499_v52 }
  0x58   : > { %563 = vrot.lane.b32.xlu0 %v485_v10, %s2199_s22  ;;  %v504_v10 = vrot.slane %v2322_v30, 2  ;;  %4156 = vst [vmem:[#allocation32_spill] sm:$0xff] %v2641_v23 }
  0x59   : > { %v2636_v5 = vsel %vm482_vm1, %v499_v52, %v501_v27  ;;  %v511_v27 = vrot.slane %v2347_v39, 2  ;;  %v508_v52 = vrot.slane %v2350_v40, 2 }
  0x5a   : > { %4155 = vst [vmem:[#allocation31_spill] sm:$0xff] %v2636_v5  ;;  %v2649_v57 = vsel %vm482_vm1, %v504_v10, %v506_v41  ;;  %v2654_v31 = vsel %vm482_vm1, %v503_v4, %v504_v10  ;;  %v514_v41 = vrot.slane %v2366_v46, 2  ;;  %v513_v10 = vrot.slane %v2372_v48, 2 }
  0x5b   : > { %569 = vrot.lane.b32.xlu1 %v2610_v2, %s2199_s22  ;;  %4157 = vst [vmem:[#allocation33_spill] sm:$0xff] %v2649_v57  ;;  %4158 = vst [vmem:[#allocation34_spill] sm:$0xff] %v2654_v31  ;;  %v2662_v6 = vsel %vm482_vm1, %v509_v7, %v511_v27  ;;  %v2667_v39 = vsel %vm482_vm1, %v508_v52, %v509_v7  ;;  %v519_v27 = vrot.slane %v2388_v54, 2  ;;  %v518_v7 = vrot.slane %v2394_v56, 2 }
  0x5c   : > { %567 = vrot.lane.b32.xlu0 %v2615_v51, %s2199_s22  ;;  %4159 = vst [vmem:[#allocation35_spill] sm:$0xff] %v2662_v6  ;;  %4160 = vst [vmem:[#allocation36_spill] sm:$0xff] %v2667_v39  ;;  %v2675_v4 = vsel %vm482_vm1, %v514_v41, %v516_v36  ;;  %v2680_v47 = vsel %vm482_vm1, %v513_v10, %v514_v41  ;;  %v524_v36 = vrot.slane %v2410_v62, 2  ;;  %v523_v41 = vrot.slane %v2416_v3, 2 }
  0x5d   : > { %4161 = vst [vmem:[#allocation37_spill] sm:$0xff] %v2675_v4  ;;  %4162 = vst [vmem:[#allocation38_spill] sm:$0xff] %v2680_v47  ;;  %v2688_v52 = vsel %vm482_vm1, %v519_v27, %v521_v21  ;;  %v2693_v55 = vsel %vm482_vm1, %v518_v7, %v519_v27  ;;  %v529_v21 = vrot.slane %v2432_v16, 2  ;;  %v528_v27 = vrot.slane %v2438_v19, 2 }
  0x5e   : > { %4163 = vst [vmem:[#allocation39_spill] sm:$0xff] %v2688_v52  ;;  %4164 = vst [vmem:[#allocation40_spill] sm:$0xff] %v2693_v55  ;;  %v2701_v10 = vsel %vm482_vm1, %v524_v36, %v526_v9  ;;  %v2706_v63 = vsel %vm482_vm1, %v523_v41, %v524_v36  ;;  %v534_v9 = vrot.slane %v2454_v34, 2  ;;  %v533_v36 = vrot.slane %v2460_v37, 2 }
  0x5f   : > { %573 = vrot.lane.b32.xlu1 %v2623_v43, %s2199_s22  ;;  %4165 = vst [vmem:[#allocation41_spill] sm:$0xff] %v2701_v10  ;;  %4166 = vst [vmem:[#allocation42_spill] sm:$0xff] %v2706_v63 }
  0x60   : > { %571 = vrot.lane.b32.xlu0 %v2628_v14, %s2199_s22 }
  0x63   : > { %577 = vrot.lane.b32.xlu1 %v2636_v5, %s2199_s22 }
  0x64   : > { %575 = vrot.lane.b32.xlu0 %v2641_v23, %s2199_s22 }
  0x67   : > { %581 = vrot.lane.b32.xlu1 %v2649_v57, %s2199_s22 }
  0x68   : > { %579 = vrot.lane.b32.xlu0 %v2654_v31, %s2199_s22 }
  0x6b   : > { %585 = vrot.lane.b32.xlu1 %v2662_v6, %s2199_s22 }
  0x6c   : > { %583 = vrot.lane.b32.xlu0 %v2667_v39, %s2199_s22 }
  0x6f   : > { %589 = vrot.lane.b32.xlu1 %v2675_v4, %s2199_s22  ;;  %v531_v4 = vrot.slane %v2435_v18, 2  ;;  %v2719_v18 = vsel %vm482_vm1, %v528_v27, %v529_v21 }
  0x70   : > { %587 = vrot.lane.b32.xlu0 %v2680_v47, %s2199_s22  ;;  %v556_v47 = vrot.slane %v2545_v45, 2  ;;  %v559_v45 = vrot.slane %v2564_v49, 2 }
  0x71   : > { %v2714_v7 = vsel %vm482_vm1, %v529_v21, %v531_v4  ;;  %v539_v4 = vrot.slane %v2476_v53, 2  ;;  %v538_v21 = vrot.slane %v2482_v59, 2 }
  0x73   : > { %593 = vrot.lane.b32.xlu1 %v2688_v52, %s2199_s22  ;;  %v536_v52 = vrot.slane %v2457_v35, 2  ;;  %v2732_v35 = vsel %vm482_vm1, %v533_v36, %v534_v9 }
  0x74   : > { %591 = vrot.lane.b32.xlu0 %v2693_v55, %s2199_s22  ;;  %4168 = vst [vmem:[#allocation44_spill] sm:$0xff] %v2732_v35  ;;  %v551_v55 = vrot.slane %v2523_v61, 2 }
  0x75   : > { %v2727_v41 = vsel %vm482_vm1, %v534_v9, %v536_v52  ;;  %v544_v52 = vrot.slane %v2498_v26, 2  ;;  %v543_v9 = vrot.slane %v2504_v50, 2 }
  0x76   : > { %4167 = vst [vmem:[#allocation43_spill] sm:$0xff] %v2727_v41 }
  0x77   : > { %597 = vrot.lane.b32.xlu1 %v2701_v10, %s2199_s22  ;;  %v541_v10 = vrot.slane %v2479_v58, 2  ;;  %v2745_v58 = vsel %vm482_vm1, %v538_v21, %v539_v4 }
  0x78   : > { %595 = vrot.lane.b32.xlu0 %v2706_v63, %s2199_s22  ;;  %v546_v63 = vrot.slane %v2501_v29, 2  ;;  %4170 = vst [vmem:[#allocation46_spill] sm:$0xff] %v2745_v58  ;;  %v2758_v29 = vsel %vm482_vm1, %v543_v9, %v544_v52 }
  0x79   : > { %v2740_v27 = vsel %vm482_vm1, %v539_v4, %v541_v10  ;;  %v549_v10 = vrot.slane %v2520_v20, 2  ;;  %4172 = vst [vmem:[#allocation48_spill] sm:$0xff] %v2758_v29  ;;  %v548_v4 = vrot.slane %v2526_v13, 2 }
  0x7a   : > { %4169 = vst [vmem:[#allocation45_spill] sm:$0xff] %v2740_v27  ;;  %v2753_v36 = vsel %vm482_vm1, %v544_v52, %v546_v63  ;;  %v554_v63 = vrot.slane %v2542_v60, 2  ;;  %v553_v52 = vrot.slane %v2548_v42, 2 }
  0x7b   : > { %601 = vrot.lane.b32.xlu1 %v2714_v7, %s2199_s22  ;;  %4171 = vst [vmem:[#allocation47_spill] sm:$0xff] %v2753_v36  ;;  %v2766_v21 = vsel %vm482_vm1, %v549_v10, %v551_v55  ;;  %v2773_v61 = vsel %vm482_vm1, %v548_v4, %v549_v10  ;;  %v558_v4 = vrot.slane %v2570_v8, 2 }
  0x7c   : > { %599 = vrot.lane.b32.xlu0 %v2719_v18, %s2199_s22  ;;  %4173 = vst [vmem:[#allocation49_spill] sm:$0xff] %v2766_v21  ;;  %4175 = vst [vmem:[#allocation51_spill] sm:$0xff] %v2773_v61  ;;  %v2783_v55 = vsel %vm482_vm1, %v554_v63, %v556_v47  ;;  %v2790_v10 = vsel %vm482_vm1, %v553_v52, %v554_v63 }
  0x7d   : > { %4177 = vst [vmem:[#allocation53_spill] sm:$0xff] %v2783_v55  ;;  %4179 = vst [vmem:[#allocation55_spill] sm:$0xff] %v2790_v10 }
  0x7f   : > { %605 = vrot.lane.b32.xlu1 %v2727_v41, %s2199_s22 }
  0x80   : > { %603 = vrot.lane.b32.xlu0 %v2732_v35, %s2199_s22  ;;  %v2940_v35 = vld [vmem:[%s2251_s20 + $0x180] sm:$0xff] }
  0x81   : > { %4192 = vst [vmem:[#allocation68_spill] sm:$0xff] %v2940_v35 }
  0x83   : > { %609 = vrot.lane.b32.xlu1 %v2740_v27, %s2199_s22 }
  0x84   : > { %607 = vrot.lane.b32.xlu0 %v2745_v58, %s2199_s22 }
  0x87   : > { %613 = vrot.lane.b32.xlu1 %v2753_v36, %s2199_s22 }
  0x88   : > { %611 = vrot.lane.b32.xlu0 %v2758_v29, %s2199_s22 }
  0x89   : > { %v2770_v6 = vpop.permute.xlu1 %390 }
  0x8a   : > { %4174 = vst [vmem:[#allocation50_spill] sm:$0xff] %v2770_v6  ;;  %v2776_v9 = vpop.permute.xlu0 %386  ;;  %v561_v6 = vrot.slane %v2567_v44, 2  ;;  %v2805_v44 = vsel %vm482_vm1, %v558_v4, %v559_v45 }
  0x8b   : > { %4176 = vst [vmem:[#allocation52_spill] sm:$0xff] %v2776_v9  ;;  %617 = vrot.lane.b32.xlu1 %v2766_v21, %s2199_s22  ;;  %4182 = vst [vmem:[#allocation58_spill] sm:$0xff] %v2805_v44 }
  0x8c   : > { %615 = vrot.lane.b32.xlu0 %v2773_v61, %s2199_s22  ;;  %v2800_v47 = vsel %vm482_vm1, %v559_v45, %v561_v6 }
  0x8d   : > { %v2787_v39 = vpop.permute.xlu1 %392  ;;  %4181 = vst [vmem:[#allocation57_spill] sm:$0xff] %v2800_v47 }
  0x8e   : > { %4178 = vst [vmem:[#allocation54_spill] sm:$0xff] %v2787_v39  ;;  %v2793_v9 = vpop.permute.xlu0 %388 }
  0x8f   : > { %4180 = vst [vmem:[#allocation56_spill] sm:$0xff] %v2793_v9  ;;  %621 = vrot.lane.b32.xlu1 %v2783_v55, %s2199_s22 }
  0x90   : > { %619 = vrot.lane.b32.xlu0 %v2790_v10, %s2199_s22 }
  0x91   : > { %v2802_v21 = vpop.permute.xlu1 %396 }
  0x92   : > { %v2807_v63 = vpop.permute.xlu0 %394 }
  0x93   : > { %625 = vrot.lane.b32.xlu1 %v2800_v47, %s2199_s22 }
  0x94   : > { %623 = vrot.lane.b32.xlu0 %v2805_v44, %s2199_s22 }
  0x95   : > { %v2813_v52 = vpop.permute.xlu1 %400 }
  0x96   : > { %v2815_v39 = vpop.permute.xlu0 %398 }
  0x97   : > { %663 = vrot.lane.b32.xlu1 %v2257_v1, %s2200_s23 }
  0x98   : > { %661 = vrot.lane.b32.xlu0 %v2254_v0, %s2200_s23 }
  0x99   : > { %v2821_v6 = vpop.permute.xlu1 %404 }
  0x9a   : > { %v2823_v45 = vpop.permute.xlu0 %402 }
  0x9b   : > { %667 = vrot.lane.b32.xlu1 %v2277_v11, %s2200_s23 }
  0x9c   : > { %665 = vrot.lane.b32.xlu0 %v2287_v15, %s2200_s23 }
  0x9d   : > { %v2829_v4 = vpop.permute.xlu1 %408 }
  0x9e   : > { %v2831_v47 = vpop.permute.xlu0 %406 }
  0x9f   : > { %671 = vrot.lane.b32.xlu1 %v2301_v22, %s2200_s23 }
  0xa0   : > { %669 = vrot.lane.b32.xlu0 %v2307_v24, %s2200_s23 }
  0xa1   : > { %v2837_v0 = vpop.permute.xlu1 %412 }
  0xa2   : > { %v2839_v1 = vpop.permute.xlu0 %410 }
  0xa3   : > { %675 = vrot.lane.b32.xlu1 %v2322_v30, %s2200_s23 }
  0xa4   : > { %673 = vrot.lane.b32.xlu0 %v2328_v32, %s2200_s23 }
  0xa5   : > { %v2845_v44 = vpop.permute.xlu1 %416 }
  0xa6   : > { %v2847_v55 = vpop.permute.xlu0 %414 }
  0xa7   : > { %679 = vrot.lane.b32.xlu1 %v2344_v38, %s2200_s23 }
  0xa8   : > { %677 = vrot.lane.b32.xlu0 %v2350_v40, %s2200_s23 }
  0xa9   : > { %v2853_v10 = vpop.permute.xlu1 %420 }
  0xaa   : > { %4183 = vst [vmem:[#allocation59_spill] sm:$0xff] %v2853_v10  ;;  %v2855_v9 = vpop.permute.xlu0 %418 }
  0xab   : > { %4184 = vst [vmem:[#allocation60_spill] sm:$0xff] %v2855_v9  ;;  %683 = vrot.lane.b32.xlu1 %v2366_v46, %s2200_s23 }
  0xac   : > { %681 = vrot.lane.b32.xlu0 %v2372_v48, %s2200_s23 }
  0xad   : > { %v2861_v61 = vpop.permute.xlu1 %424 }
  0xae   : > { %4185 = vst [vmem:[#allocation61_spill] sm:$0xff] %v2861_v61  ;;  %v2863_v57 = vpop.permute.xlu0 %422 }
  0xaf   : > { %4186 = vst [vmem:[#allocation62_spill] sm:$0xff] %v2863_v57  ;;  %687 = vrot.lane.b32.xlu1 %v2388_v54, %s2200_s23 }
  0xb0   : > { %685 = vrot.lane.b32.xlu0 %v2394_v56, %s2200_s23 }
  0xb1   : > { %v2869_v36 = vpop.permute.xlu1 %428 }
  0xb2   : > { %v2871_v10 = vpop.permute.xlu0 %426 }
  0xb3   : > { %691 = vrot.lane.b32.xlu1 %v2410_v62, %s2200_s23 }
  0xb4   : > { %689 = vrot.lane.b32.xlu0 %v2416_v3, %s2200_s23 }
  0xb5   : > { %v2877_v9 = vpop.permute.xlu1 %432 }
  0xb6   : > { %v2879_v61 = vpop.permute.xlu0 %430 }
  0xb7   : > { %695 = vrot.lane.b32.xlu1 %v2432_v16, %s2200_s23 }
  0xb8   : > { %693 = vrot.lane.b32.xlu0 %v2438_v19, %s2200_s23 }
  0xb9   : > { %v2885_v57 = vpop.permute.xlu1 %436 }
  0xba   : > { %v2887_v29 = vpop.permute.xlu0 %434 }
  0xbb   : > { %699 = vrot.lane.b32.xlu1 %v2454_v34, %s2200_s23 }
  0xbc   : > { %697 = vrot.lane.b32.xlu0 %v2460_v37, %s2200_s23 }
  0xbd   : > { %v2893_v62 = vpop.permute.xlu1 %440 }
  0xbe   : > { %v2895_v3 = vpop.permute.xlu0 %438 }
  0xbf   : > { %703 = vrot.lane.b32.xlu1 %v2476_v53, %s2200_s23 }
  0xc0   : > { %701 = vrot.lane.b32.xlu0 %v2482_v59, %s2200_s23 }
  0xc1   : > { %v2901_v16 = vpop.permute.xlu1 %444 }
  0xc2   : > { %v2903_v19 = vpop.permute.xlu0 %442 }
  0xc3   : > { %707 = vrot.lane.b32.xlu1 %v2498_v26, %s2200_s23 }
  0xc4   : > { %705 = vrot.lane.b32.xlu0 %v2504_v50, %s2200_s23 }
  0xc5   : > { %v2909_v31 = vpop.permute.xlu1 %448 }
  0xc6   : > { %v2911_v5 = vpop.permute.xlu0 %446 }
  0xc7   : > { %711 = vrot.lane.b32.xlu1 %v2520_v20, %s2200_s23 }
  0xc8   : > { %709 = vrot.lane.b32.xlu0 %v2526_v13, %s2200_s23 }
  0xc9   : > { %v2917_v27 = vpop.permute.xlu1 %565 }
  0xca   : > { %4187 = vst [vmem:[#allocation63_spill] sm:$0xff] %v2917_v27  ;;  %v2919_v58 = vpop.permute.xlu0 %563  ;;  %v2934_v27 = vld [vmem:[%s2251_s20 + $0x188] sm:$0xff] }
  0xcb   : > { %4188 = vst [vmem:[#allocation64_spill] sm:$0xff] %v2919_v58  ;;  %715 = vrot.lane.b32.xlu1 %v2542_v60, %s2200_s23  ;;  %4191 = vst [vmem:[#allocation67_spill] sm:$0xff] %v2934_v27  ;;  %v1267_v58 = vsel %vm1261_vm2, %v2277_v11, %v2802_v21  ;;  %v1269_v21 = vsel %vm1261_vm2, %v2301_v22, %v2813_v52 }
  0xcc   : > { %713 = vrot.lane.b32.xlu0 %v2548_v42, %s2200_s23 }
  0xcd   : > { %v2925_v23 = vpop.permute.xlu1 %569 }
  0xce   : > { %4189 = vst [vmem:[#allocation65_spill] sm:$0xff] %v2925_v23  ;;  %v2927_v43 = vpop.permute.xlu0 %567  ;;  %v1266_v23 = vsel %vm1261_vm2, %v2287_v15, %v2807_v63  ;;  %v1271_v63 = vsel %vm1261_vm2, %v2322_v30, %v2821_v6  ;;  %v1272_v30 = vsel %vm1261_vm2, %v2350_v40, %v2831_v47  ;;  %v1274_v40 = vsel %vm1261_vm2, %v2372_v48, %v2839_v1 }
  0xcf   : > { %4190 = vst [vmem:[#allocation66_spill] sm:$0xff] %v2927_v43  ;;  %719 = vrot.lane.b32.xlu1 %v2564_v49, %s2200_s23  ;;  %v1276_v48 = vsel %vm1261_vm2, %v2394_v56, %v2847_v55  ;;  %v4199_v56 = vld [vmem:[#allocation9_spill] sm:$0xff] }
  0xd0   : > { %717 = vrot.lane.b32.xlu0 %v2570_v8, %s2200_s23 }
  0xd1   : > { %v574_v41 = vpop.permute.xlu1 %573 }
  0xd2   : > { %v2946_v43 = vsel %vm1294_vm3, %v1267_v58, %v574_v41  ;;  %v572_v14 = vpop.permute.xlu0 %571  ;;  %v1268_v41 = vsel %vm1261_vm2, %v2307_v24, %v2815_v39 }
  0xd3   : > { %v2949_v8 = vsel %vm1294_vm3, %v1266_v23, %v572_v14  ;;  %723 = vrot.lane.b32.xlu1 %v2934_v27, %s2200_s23 }
  0xd4   : > { %721 = vrot.lane.b32.xlu0 %v2940_v35, %s2200_s23 }
  0xd5   : > { %v578_v11 = vpop.permute.xlu1 %577 }
  0xd6   : > { %v2962_v58 = vsel %vm1294_vm3, %v1269_v21, %v578_v11  ;;  %v576_v14 = vpop.permute.xlu0 %575  ;;  %v1270_v11 = vsel %vm1261_vm2, %v2328_v32, %v2823_v45 }
  0xd7   : > { %v2965_v23 = vsel %vm1294_vm3, %v1268_v41, %v576_v14  ;;  %765 = vrot.lane.b32.xlu1 %v2294_v17, %s2201_s24  ;;  %v4193_v14 = vld [vmem:[#allocation3_spill] sm:$0xff] }
  0xd8   : > { %763 = vrot.lane.b32.xlu0 %v2280_v12, %s2201_s24  ;;  %v1273_v12 = vsel %vm1261_vm2, %v2344_v38, %v2829_v4  ;;  %v1275_v38 = vsel %vm1261_vm2, %v2366_v46, %v2837_v0  ;;  %v1277_v46 = vsel %vm1261_vm2, %v2388_v54, %v2845_v44  ;;  %v4198_v44 = vld [vmem:[#allocation8_spill] sm:$0xff] }
  0xd9   : > { %v582_v52 = vpop.permute.xlu1 %581 }
  0xda   : > { %v2978_v39 = vsel %vm1294_vm3, %v1271_v63, %v582_v52  ;;  %v580_v21 = vpop.permute.xlu0 %579 }
  0xdb   : > { %v2981_v41 = vsel %vm1294_vm3, %v1270_v11, %v580_v21  ;;  %769 = vrot.lane.b32.xlu1 %v2313_v25, %s2201_s24  ;;  %v4194_v11 = vld [vmem:[#allocation4_spill] sm:$0xff]  ;;  %v4195_v21 = vld [vmem:[#allocation5_spill] sm:$0xff] }
  0xdc   : > { %767 = vrot.lane.b32.xlu0 %v2318_v28, %s2201_s24 }
  0xdd   : > { %v586_v17 = vpop.permute.xlu1 %585 }
  0xde   : > { %v2994_v32 = vsel %vm1294_vm3, %v1273_v12, %v586_v17  ;;  %v584_v6 = vpop.permute.xlu0 %583 }
  0xdf   : > { %v2997_v45 = vsel %vm1294_vm3, %v1272_v30, %v584_v6  ;;  %773 = vrot.lane.b32.xlu1 %v2335_v33, %s2201_s24  ;;  %v4196_v30 = vld [vmem:[#allocation6_spill] sm:$0xff]  ;;  %v4197_v6 = vld [vmem:[#allocation7_spill] sm:$0xff] }
  0xe0   : > { %771 = vrot.lane.b32.xlu0 %v4193_v14, %s2201_s24 }
  0xe1   : > { %v590_v4 = vpop.permute.xlu1 %589 }
  0xe2   : > { %v3010_v47 = vsel %vm1294_vm3, %v1275_v38, %v590_v4  ;;  %v588_v63 = vpop.permute.xlu0 %587 }
  0xe3   : > { %v3013_v52 = vsel %vm1294_vm3, %v1274_v40, %v588_v63  ;;  %777 = vrot.lane.b32.xlu1 %v4194_v11, %s2201_s24  ;;  %v4201_v40 = vld [vmem:[#allocation10_spill] sm:$0xff]  ;;  %v4202_v63 = vld [vmem:[#allocation11_spill] sm:$0xff] }
  0xe4   : > { %775 = vrot.lane.b32.xlu0 %v4195_v21, %s2201_s24 }
  0xe5   : > { %v594_v0 = vpop.permute.xlu1 %593 }
  0xe6   : > { %v3026_v1 = vsel %vm1294_vm3, %v1277_v46, %v594_v0  ;;  %v592_v12 = vpop.permute.xlu0 %591  ;;  %v1283_v46 = vsel %vm1261_vm2, %v2454_v34, %v2869_v36  ;;  %v1285_v36 = vsel %vm1261_vm2, %v2476_v53, %v2877_v9  ;;  %v1287_v9 = vsel %vm1261_vm2, %v2498_v26, %v2885_v57 }
  0xe7   : > { %v3029_v17 = vsel %vm1294_vm3, %v1276_v48, %v592_v12  ;;  %781 = vrot.lane.b32.xlu1 %v4196_v30, %s2201_s24  ;;  %v1282_v48 = vsel %vm1261_vm2, %v2460_v37, %v2871_v10  ;;  %v1284_v10 = vsel %vm1261_vm2, %v2482_v59, %v2879_v61  ;;  %v1286_v61 = vsel %vm1261_vm2, %v2504_v50, %v2887_v29 }
  0xe8   : > { %779 = vrot.lane.b32.xlu0 %v4197_v6, %s2201_s24  ;;  %v1289_v57 = vsel %vm1261_vm2, %v2520_v20, %v2893_v62  ;;  %v1288_v29 = vsel %vm1261_vm2, %v2526_v13, %v2895_v3  ;;  %v1290_v3 = vsel %vm1261_vm2, %v2548_v42, %v2903_v19  ;;  %v4207_v42 = vld [vmem:[#allocation24_spill] sm:$0xff] }
  0xe9   : > { %v3035_v38 = vpop.permute.xlu1 %597 }
  0xea   : > { %v3037_v54 = vpop.permute.xlu0 %595 }
  0xeb   : > { %785 = vrot.lane.b32.xlu1 %v4198_v44, %s2201_s24 }
  0xec   : > { %783 = vrot.lane.b32.xlu0 %v4199_v56, %s2201_s24 }
  0xed   : > { %v3043_v55 = vpop.permute.xlu1 %601 }
  0xee   : > { %4200 = vst [vmem:[#allocation3_spill] sm:$0xff] %v3043_v55  ;;  %v3045_v4 = vpop.permute.xlu0 %599 }
  0xef   : > { %789 = vrot.lane.b32.xlu1 %v4201_v40, %s2201_s24  ;;  %v4203_v40 = vld [vmem:[#allocation12_spill] sm:$0xff] }
  0xf0   : > { %787 = vrot.lane.b32.xlu0 %v4202_v63, %s2201_s24  ;;  %v4204_v63 = vld [vmem:[#allocation13_spill] sm:$0xff] }
  0xf1   : > { %v606_v0 = vpop.permute.xlu1 %605 }
  0xf2   : > { %v3058_v12 = vsel %vm1294_vm3, %v1283_v46, %v606_v0  ;;  %v604_v27 = vpop.permute.xlu0 %603 }
  0xf3   : > { %v3061_v35 = vsel %vm1294_vm3, %v1282_v48, %v604_v27  ;;  %793 = vrot.lane.b32.xlu1 %v4203_v40, %s2201_s24  ;;  %v4205_v48 = vld [vmem:[#allocation14_spill] sm:$0xff]  ;;  %v4206_v40 = vld [vmem:[#allocation15_spill] sm:$0xff] }
  0xf4   : > { %791 = vrot.lane.b32.xlu0 %v4204_v63, %s2201_s24 }
  0xf5   : > { %v610_v55 = vpop.permute.xlu1 %609 }
  0xf6   : > { %v3074_v46 = vsel %vm1294_vm3, %v1285_v36, %v610_v55  ;;  %v608_v27 = vpop.permute.xlu0 %607 }
  0xf7   : > { %v3077_v0 = vsel %vm1294_vm3, %v1284_v10, %v608_v27  ;;  %797 = vrot.lane.b32.xlu1 %v4205_v48, %s2201_s24 }
  0xf8   : > { %795 = vrot.lane.b32.xlu0 %v4206_v40, %s2201_s24 }
  0xf9   : > { %v614_v63 = vpop.permute.xlu1 %613 }
  0xfa   : > { %v3090_v55 = vsel %vm1294_vm3, %v1287_v9, %v614_v63  ;;  %v612_v36 = vpop.permute.xlu0 %611 }
  0xfb   : > { %v3093_v10 = vsel %vm1294_vm3, %v1286_v61, %v612_v36  ;;  %896 = vrot.lane.b32.xlu1 %v2719_v18, %s2202_s25 }
  0xfc   : > { %864 = vrot.lane.b32.xlu0 %v2615_v51, %s2202_s25  ;;  %v1291_v51 = vsel %vm1261_vm2, %v2542_v60, %v2901_v16  ;;  %v1293_v60 = vsel %vm1261_vm2, %v2564_v49, %v2909_v31  ;;  %v1292_v16 = vsel %vm1261_vm2, %v4207_v42, %v2911_v5  ;;  %v1529_v49 = vld [vmem:[%s4015_s1 + $0x20] sm:$0xf]  ;;  %v4209_v31 = vld [vmem:[#allocation17_spill] sm:$0xff] }
  0xfd   : > { %v618_v27 = vpop.permute.xlu1 %617  ;;  %2053 = vmatprep.subr.msk.mxu0 %vm1634_vm4, %v1529_v49  ;;  %2111 = vmatprep.subr.msk.mxu1 %vm1634_vm4, %v1529_v49 }
  0xfe   : > { %v3106_v63 = vsel %vm1294_vm3, %v1289_v57, %v618_v27  ;;  %v616_v9 = vpop.permute.xlu0 %615  ;;  %2054 = vmatpush3.msk.msra.mxu0 %vm1634_vm4, %v1529_v49  ;;  %2116 = vmatpush3.msk.msra.mxu1 %vm1634_vm4, %v1529_v49 }
  0xff   : > { %v3109_v61 = vsel %vm1294_vm3, %v1288_v29, %v616_v9  ;;  %898 = vrot.lane.b32.xlu1 %v2714_v7, %s2202_s25 }
 0x100   : > { %866 = vrot.lane.b32.xlu0 %v2610_v2, %s2202_s25 }
 0x101   : > { %v622_v62 = vpop.permute.xlu1 %621 }
 0x102   : > { %v3122_v36 = vsel %vm1294_vm3, %v1291_v51, %v622_v62  ;;  %v620_v57 = vpop.permute.xlu0 %619  ;;  %v1527_v51 = vld [vmem:[%s4015_s1 + $0x10] sm:$0xff] }
 0x103   : > { %v3125_v27 = vsel %vm1294_vm3, %v1290_v3, %v620_v57  ;;  %994 = vrot.lane.b32.xlu1 %v2460_v37, %s2203_s26  ;;  %v1525_v57 = vld [vmem:[%s4015_s1] sm:$0xff] }
 0x104   : > { %962 = vrot.lane.b32.xlu0 %v2287_v15, %s2203_s26  ;;  %v4208_v15 = vld [vmem:[#allocation2_spill] sm:$0xff] }
 0x105   : > { %v626_v2 = vpop.permute.xlu1 %625 }
 0x106   : > { %v3138_v19 = vsel %vm1294_vm3, %v1293_v60, %v626_v2  ;;  %v624_v29 = vpop.permute.xlu0 %623 }
 0x107   : > { %v3141_v9 = vsel %vm1294_vm3, %v1292_v16, %v624_v29  ;;  %996 = vrot.lane.b32.xlu1 %v2454_v34, %s2203_s26  ;;  %v1528_v34 = vld [vmem:[%s4015_s1 + $0x18] sm:$0xff]  ;;  %v4210_v16 = vld [vmem:[#allocation30_spill] sm:$0xff]  ;;  %v4211_v29 = vld [vmem:[#allocation16_spill] sm:$0xff] }
 0x108   : > { %964 = vrot.lane.b32.xlu0 %v4208_v15, %s2203_s26  ;;  %2055 = vmatprep.subr.mxu0 %v1528_v34 }
 0x109   : > { %v3150_v37 = vpop.permute.xlu1 %663  ;;  %2112 = vmatprep.subr.mxu1 %v1528_v34  ;;  %2056 = vmatpush3.msra.mxu0 %v1528_v34 }
 0x10a   : > { %v3152_v5 = vpop.permute.xlu0 %661  ;;  %2117 = vmatpush3.msra.mxu1 %v1528_v34  ;;  %2057 = vmatprep.subr.mxu0 %v1527_v51  ;;  %v4212_v34 = vld [vmem:[#allocation44_spill] sm:$0xff] }
 0x10b   : > { %1096 = vrot.lane.b32.xlu1 %v4209_v31, %s2204_s4  ;;  %2113 = vmatprep.subr.mxu1 %v1527_v51 }
 0x10c   : > { %1064 = vrot.lane.b32.xlu0 %v2318_v28, %s2204_s4  ;;  %2058 = vmatpush3.msra.mxu0 %v1527_v51  ;;  %v1526_v28 = vld [vmem:[%s4015_s1 + $0x8] sm:$0xff] }
 0x10d   : > { %v3164_v62 = vpop.permute.xlu1 %667  ;;  %2118 = vmatpush3.msra.mxu1 %v1527_v51  ;;  %2059 = vmatprep.subr.mxu0 %v1526_v28 }
 0x10e   : > { %v3166_v3 = vpop.permute.xlu0 %665  ;;  %2114 = vmatprep.subr.mxu1 %v1526_v28  ;;  %2060 = vmatpush3.msra.mxu0 %v1526_v28 }
 0x10f   : > { %1066 = vrot.lane.b32.xlu1 %v2313_v25, %s2204_s4  ;;  %2119 = vmatpush3.msra.mxu1 %v1526_v28 }
 0x110   : > { %799 = vrot.lane.b32.xlu0 %v4209_v31, %s2201_s24  ;;  %2061 = vmatprep.subr.mxu0 %v1525_v57 }
 0x111   : > { %v672_v60 = vpop.permute.xlu1 %671  ;;  %2115 = vmatprep.subr.mxu1 %v1525_v57  ;;  %2062 = vmatpush3.msra.mxu0 %v1525_v57 }
 0x112   : > { %v3180_v25 = vsel %vm1327_vm5, %v2946_v43, %v672_v60  ;;  %v670_v2 = vpop.permute.xlu0 %669  ;;  %2120 = vmatpush3.msra.mxu1 %v1525_v57 }
 0x113   : > { %v3184_v42 = vsel %vm1327_vm5, %v2949_v8, %v670_v2  ;;  %1165 = vrot.lane.b32.xlu1 %v4210_v16, %s2205_s11  ;;  %v4214_v2 = vld [vmem:[#allocation43_spill] sm:$0xff] }
 0x114   : > { %1098 = vrot.lane.b32.xlu0 %v4211_v29, %s2204_s4 }
 0x115   : > { %v676_v15 = vpop.permute.xlu1 %675 }
 0x116   : > { %v3192_v43 = vsel %vm1327_vm5, %v2962_v58, %v676_v15  ;;  %v674_v49 = vpop.permute.xlu0 %673 }
 0x117   : > { %v3196_v8 = vsel %vm1327_vm5, %v2965_v23, %v674_v49  ;;  %801 = vrot.lane.b32.xlu1 %v4211_v29, %s2201_s24 }
 0x118   : > { %1197 = vrot.lane.b32.xlu0 %v4212_v34, %s2205_s11 }
 0x119   : > { %v680_v31 = vpop.permute.xlu1 %679 }
 0x11a   : > { %v3204_v51 = vsel %vm1327_vm5, %v2978_v39, %v680_v31  ;;  %v678_v28 = vpop.permute.xlu0 %677 }
 0x11b   : > { %v3208_v58 = vsel %vm1327_vm5, %v2981_v41, %v678_v28  ;;  %900 = vrot.lane.b32.xlu1 %v4212_v34, %s2202_s25  ;;  %v4215_v41 = vld [vmem:[#allocation29_spill] sm:$0xff]  ;;  %v4220_v28 = vld [vmem:[#allocation19_spill] sm:$0xff] }
 0x11c   : > { %868 = vrot.lane.b32.xlu0 %v4210_v16, %s2202_s25 }
 0x11d   : > { %v684_v23 = vpop.permute.xlu1 %683 }
 0x11e   : > { %v3216_v57 = vsel %vm1327_vm5, %v2994_v32, %v684_v23  ;;  %v682_v60 = vpop.permute.xlu0 %681 }
 0x11f   : > { %4213 = vst [vmem:[#allocation4_spill] sm:$0xff] %v3216_v57  ;;  %v3220_v39 = vsel %vm1327_vm5, %v2997_v45, %v682_v60  ;;  %1199 = vrot.lane.b32.xlu1 %v4214_v2, %s2205_s11 }
 0x120   : > { %1167 = vrot.lane.b32.xlu0 %v4215_v41, %s2205_s11 }
 0x121   : > { %v688_v29 = vpop.permute.xlu1 %687 }
 0x122   : > { %v3228_v16 = vsel %vm1327_vm5, %v3010_v47, %v688_v29  ;;  %v686_v15 = vpop.permute.xlu0 %685 }
 0x123   : > { %4216 = vst [vmem:[#allocation5_spill] sm:$0xff] %v3228_v16  ;;  %v3232_v32 = vsel %vm1327_vm5, %v3013_v52, %v686_v15  ;;  %902 = vrot.lane.b32.xlu1 %v4214_v2, %s2202_s25  ;;  %v4221_v2 = vld [vmem:[#allocation32_spill] sm:$0xff] }
 0x124   : > { %4217 = vst [vmem:[#allocation6_spill] sm:$0xff] %v3232_v32  ;;  %870 = vrot.lane.b32.xlu0 %v4215_v41, %s2202_s25 }
 0x125   : > { %v692_v45 = vpop.permute.xlu1 %691 }
 0x126   : > { %v3240_v49 = vsel %vm1327_vm5, %v3026_v1, %v692_v45  ;;  %v690_v34 = vpop.permute.xlu0 %689 }
 0x127   : > { %4218 = vst [vmem:[#allocation7_spill] sm:$0xff] %v3240_v49  ;;  %v3244_v47 = vsel %vm1327_vm5, %v3029_v17, %v690_v34  ;;  %998 = vrot.lane.b32.xlu1 %v2482_v59, %s2203_s26  ;;  %v4242_v49 = vld [vmem:[#allocation33_spill] sm:$0xff] }
 0x128   : > { %4219 = vst [vmem:[#allocation8_spill] sm:$0xff] %v3244_v47  ;;  %966 = vrot.lane.b32.xlu0 %v2307_v24, %s2203_s26 }
 0x129   : > { %v3250_v52 = vpop.permute.xlu1 %695 }
 0x12a   : > { %v3252_v31 = vpop.permute.xlu0 %693 }
 0x12b   : > { %1000 = vrot.lane.b32.xlu1 %v2476_v53, %s2203_s26 }
 0x12c   : > { %968 = vrot.lane.b32.xlu0 %v2301_v22, %s2203_s26 }
 0x12d   : > { %v3258_v1 = vpop.permute.xlu1 %699 }
 0x12e   : > { %v3260_v17 = vpop.permute.xlu0 %697 }
 0x12f   : > { %1100 = vrot.lane.b32.xlu1 %v4220_v28, %s2204_s4 }
 0x130   : > { %1068 = vrot.lane.b32.xlu0 %v4193_v14, %s2204_s4 }
 0x131   : > { %v704_v24 = vpop.permute.xlu1 %703 }
 0x132   : > { %v3268_v59 = vsel %vm1327_vm5, %v3058_v12, %v704_v24  ;;  %v702_v23 = vpop.permute.xlu0 %701 }
 0x133   : > { %v3272_v53 = vsel %vm1327_vm5, %v3061_v35, %v702_v23  ;;  %1070 = vrot.lane.b32.xlu1 %v2335_v33, %s2204_s4  ;;  %v4222_v35 = vld [vmem:[#allocation18_spill] sm:$0xff]  ;;  %v4229_v23 = vld [vmem:[#allocation31_spill] sm:$0xff] }
 0x134   : > { %803 = vrot.lane.b32.xlu0 %v4220_v28, %s2201_s24 }
 0x135   : > { %v708_v22 = vpop.permute.xlu1 %707 }
 0x136   : > { %v3280_v14 = vsel %vm1327_vm5, %v3074_v46, %v708_v22  ;;  %v706_v60 = vpop.permute.xlu0 %705 }
 0x137   : > { %v3284_v12 = vsel %vm1327_vm5, %v3077_v0, %v706_v60  ;;  %1169 = vrot.lane.b32.xlu1 %v4221_v2, %s2205_s11  ;;  %v4223_v0 = vld [vmem:[#allocation46_spill] sm:$0xff] }
 0x138   : > { %1102 = vrot.lane.b32.xlu0 %v4222_v35, %s2204_s4 }
 0x139   : > { %v712_v33 = vpop.permute.xlu1 %711 }
 0x13a   : > { %v3292_v41 = vsel %vm1327_vm5, %v3090_v55, %v712_v33  ;;  %v710_v29 = vpop.permute.xlu0 %709 }
 0x13b   : > { %v3296_v46 = vsel %vm1327_vm5, %v3093_v10, %v710_v29  ;;  %805 = vrot.lane.b32.xlu1 %v4222_v35, %s2201_s24  ;;  %v2155_v29 = vld [vmem:[%s2251_s20 + $0x68] sm:$0xff] }
 0x13c   : > { %1201 = vrot.lane.b32.xlu0 %v4223_v0, %s2205_s11 }
 0x13d   : > { %v716_v15 = vpop.permute.xlu1 %715 }
 0x13e   : > { %v3304_v45 = vsel %vm1327_vm5, %v3106_v63, %v716_v15  ;;  %v714_v34 = vpop.permute.xlu0 %713 }
 0x13f   : > { %4224 = vst [vmem:[#allocation9_spill] sm:$0xff] %v3304_v45  ;;  %v3308_v55 = vsel %vm1327_vm5, %v3109_v61, %v714_v34  ;;  %904 = vrot.lane.b32.xlu1 %v4223_v0, %s2202_s25  ;;  %v4228_v61 = vld [vmem:[#allocation45_spill] sm:$0xff] }
 0x140   : > { %4225 = vst [vmem:[#allocation14_spill] sm:$0xff] %v3308_v55  ;;  %872 = vrot.lane.b32.xlu0 %v4221_v2, %s2202_s25  ;;  %v4232_v34 = vld [vmem:[#allocation21_spill] sm:$0xff]  ;;  %v4249_v55 = vld [vmem:[#allocation51_spill] sm:$0xff] }
 0x141   : > { %v720_v10 = vpop.permute.xlu1 %719 }
 0x142   : > { %v3316_v28 = vsel %vm1327_vm5, %v3122_v36, %v720_v10  ;;  %v718_v24 = vpop.permute.xlu0 %717 }
 0x143   : > { %4226 = vst [vmem:[#allocation15_spill] sm:$0xff] %v3316_v28  ;;  %v3320_v63 = vsel %vm1327_vm5, %v3125_v27, %v718_v24  ;;  %1203 = vrot.lane.b32.xlu1 %v4228_v61, %s2205_s11 }
 0x144   : > { %4227 = vst [vmem:[#allocation24_spill] sm:$0xff] %v3320_v63  ;;  %1171 = vrot.lane.b32.xlu0 %v4229_v23, %s2205_s11  ;;  %v4244_v63 = vld [vmem:[#allocation52_spill] sm:$0xff] }
 0x145   : > { %v724_v22 = vpop.permute.xlu1 %723 }
 0x146   : > { %v3328_v60 = vsel %vm1327_vm5, %v3138_v19, %v724_v22  ;;  %v722_v2 = vpop.permute.xlu0 %721  ;;  %v2154_v19 = vld [vmem:[%s2251_s20 + $0x60] sm:$0xff] }
 0x147   : > { %4230 = vst [vmem:[#allocation2_spill] sm:$0xff] %v3328_v60  ;;  %v3332_v36 = vsel %vm1327_vm5, %v3141_v9, %v722_v2  ;;  %906 = vrot.lane.b32.xlu1 %v4228_v61, %s2202_s25  ;;  %v4233_v61 = vld [vmem:[#allocation34_spill] sm:$0xff] }
 0x148   : > { %4231 = vst [vmem:[#allocation17_spill] sm:$0xff] %v3332_v36  ;;  %874 = vrot.lane.b32.xlu0 %v4229_v23, %s2202_s25  ;;  %v4234_v23 = vld [vmem:[#allocation20_spill] sm:$0xff] }
 0x149   : > { %v3338_v27 = vpop.permute.xlu1 %765 }
 0x14a   : > { %v3340_v35 = vpop.permute.xlu0 %763 }
 0x14b   : > { %1002 = vrot.lane.b32.xlu1 %v2504_v50, %s2203_s26 }
 0x14c   : > { %970 = vrot.lane.b32.xlu0 %v2154_v19, %s2203_s26 }
 0x14d   : > { %v3346_v33 = vpop.permute.xlu1 %769 }
 0x14e   : > { %v3348_v9 = vpop.permute.xlu0 %767 }
 0x14f   : > { %1004 = vrot.lane.b32.xlu1 %v2498_v26, %s2203_s26 }
 0x150   : > { %972 = vrot.lane.b32.xlu0 %v2155_v29, %s2203_s26 }
 0x151   : > { %v3354_v0 = vpop.permute.xlu1 %773 }
 0x152   : > { %v3356_v15 = vpop.permute.xlu0 %771 }
 0x153   : > { %1104 = vrot.lane.b32.xlu1 %v4232_v34, %s2204_s4 }
 0x154   : > { %1072 = vrot.lane.b32.xlu0 %v4195_v21, %s2204_s4 }
 0x155   : > { %v3362_v50 = vpop.permute.xlu1 %777 }
 0x156   : > { %v3364_v10 = vpop.permute.xlu0 %775 }
 0x157   : > { %1074 = vrot.lane.b32.xlu1 %v4194_v11, %s2204_s4  ;;  %v4236_v11 = vld [vmem:[#allocation48_spill] sm:$0xff] }
 0x158   : > { %807 = vrot.lane.b32.xlu0 %v4232_v34, %s2201_s24 }
 0x159   : > { %v3370_v26 = vpop.permute.xlu1 %781 }
 0x15a   : > { %v3372_v24 = vpop.permute.xlu0 %779 }
 0x15b   : > { %1173 = vrot.lane.b32.xlu1 %v4233_v61, %s2205_s11 }
 0x15c   : > { %1106 = vrot.lane.b32.xlu0 %v4234_v23, %s2204_s4 }
 0x15d   : > { %v3378_v21 = vpop.permute.xlu1 %785 }
 0x15e   : > { %4235 = vst [vmem:[#allocation30_spill] sm:$0xff] %v3378_v21  ;;  %v3380_v22 = vpop.permute.xlu0 %783 }
 0x15f   : > { %809 = vrot.lane.b32.xlu1 %v4234_v23, %s2201_s24  ;;  %v4241_v23 = vld [vmem:[#allocation47_spill] sm:$0xff] }
 0x160   : > { %1205 = vrot.lane.b32.xlu0 %v4236_v11, %s2205_s11 }
 0x161   : > { %v3386_v2 = vpop.permute.xlu1 %789 }
 0x162   : > { %4237 = vst [vmem:[#allocation16_spill] sm:$0xff] %v3386_v2  ;;  %v3388_v19 = vpop.permute.xlu0 %787  ;;  %v4243_v2 = vld [vmem:[#allocation23_spill] sm:$0xff] }
 0x163   : > { %4238 = vst [vmem:[#allocation44_spill] sm:$0xff] %v3388_v19  ;;  %908 = vrot.lane.b32.xlu1 %v4236_v11, %s2202_s25  ;;  %v4245_v19 = vld [vmem:[#allocation36_spill] sm:$0xff] }
 0x164   : > { %876 = vrot.lane.b32.xlu0 %v4233_v61, %s2202_s25 }
 0x165   : > { %v3394_v29 = vpop.permute.xlu1 %793 }
 0x166   : > { %4239 = vst [vmem:[#allocation43_spill] sm:$0xff] %v3394_v29  ;;  %v3396_v34 = vpop.permute.xlu0 %791  ;;  %v2156_v29 = vld [vmem:[%s2251_s20 + $0x78] sm:$0xff] }
 0x167   : > { %4240 = vst [vmem:[#allocation29_spill] sm:$0xff] %v3396_v34  ;;  %1207 = vrot.lane.b32.xlu1 %v4241_v23, %s2205_s11 }
 0x168   : > { %1175 = vrot.lane.b32.xlu0 %v4242_v49, %s2205_s11 }
 0x169   : > { %v3402_v60 = vpop.permute.xlu1 %797 }
 0x16a   : > { %v796_v47 = vpop.permute.xlu0 %795 }
 0x16b   : > { %910 = vrot.lane.b32.xlu1 %v4241_v23, %s2202_s25  ;;  %v2157_v23 = vld [vmem:[%s2251_s20 + $0x80] sm:$0xff] }
 0x16c   : > { %878 = vrot.lane.b32.xlu0 %v4242_v49, %s2202_s25 }
 0x16d   : > { %v897_v61 = vpop.permute.xlu1 %896 }
 0x16e   : > { %v865_v11 = vpop.permute.xlu0 %864 }
 0x16f   : > { %1006 = vrot.lane.b32.xlu1 %v2526_v13, %s2203_s26 }
 0x170   : > { %974 = vrot.lane.b32.xlu0 %v2156_v29, %s2203_s26 }
 0x171   : > { %v3412_v34 = vpop.permute.xlu1 %898 }
 0x172   : > { %v3414_v36 = vpop.permute.xlu0 %866 }
 0x173   : > { %1008 = vrot.lane.b32.xlu1 %v2520_v20, %s2203_s26 }
 0x174   : > { %976 = vrot.lane.b32.xlu0 %v2157_v23, %s2203_s26  ;;  %v2158_v23 = vld [vmem:[%s2251_s20] sm:$0xff] }
 0x175   : > { %v995_v49 = vpop.permute.xlu1 %994  ;;  %v1262_v32 = vsel %vm1261_vm2, %v2158_v23, %v4244_v63 }
 0x176   : > { %v963_v16 = vpop.permute.xlu0 %962 }
 0x177   : > { %1108 = vrot.lane.b32.xlu1 %v4243_v2, %s2204_s4 }
 0x178   : > { %1076 = vrot.lane.b32.xlu0 %v4197_v6, %s2204_s4  ;;  %v4246_v6 = vld [vmem:[#allocation64_spill] sm:$0xff] }
 0x179   : > { %v997_v13 = vpop.permute.xlu1 %996  ;;  %v1295_v57 = vsel %vm1294_vm3, %v1262_v32, %v4246_v6  ;;  %v3449_v32 = vld [vmem:[%s2251_s20 + $0xc0] sm:$0xff]  ;;  %v4248_v6 = vld [vmem:[#allocation60_spill] sm:$0xff] }
 0x17a   : > { %v3424_v29 = vpop.permute.xlu0 %964 }
 0x17b   : > { %1078 = vrot.lane.b32.xlu1 %v4196_v30, %s2204_s4  ;;  %v4247_v30 = vld [vmem:[#allocation22_spill] sm:$0xff] }
 0x17c   : > { %811 = vrot.lane.b32.xlu0 %v4243_v2, %s2201_s24  ;;  %v1328_v2 = vsel %vm1327_vm5, %v1295_v57, %v3152_v5  ;;  %v1278_v5 = vsel %vm1261_vm2, %v3449_v32, %v4248_v6 }
 0x17d   : > { %v1097_v20 = vpop.permute.xlu1 %1096  ;;  %v1361_v45 = vsel %vm1360_vm6, %v1328_v2, %v3340_v35 }
 0x17e   : > { %v1065_v28 = vpop.permute.xlu0 %1064  ;;  %v1394_v23 = vsel %vm1393_vm7, %v1361_v45, %v865_v11  ;;  %v1311_v45 = vsel %vm1294_vm3, %v1278_v5, %v3037_v54 }
 0x17f   : > { %1177 = vrot.lane.b32.xlu1 %v4245_v19, %s2205_s11  ;;  %v1427_v57 = vsel %vm1426_vm8, %v1394_v23, %v963_v16 }
 0x180   : > { %1110 = vrot.lane.b32.xlu0 %v4247_v30, %s2204_s4  ;;  %v1460_v35 = vsel %vm1459_vm9, %v1427_v57, %v1065_v28  ;;  %v3475_v57 = vld [vmem:[%s2251_s20 + $0xc8] sm:$0xff] }
 0x181   : > { %v1067_v21 = vpop.permute.xlu1 %1066 }
 0x182   : > { %v3443_v63 = vpop.permute.xlu0 %799 }
 0x183   : > { %813 = vrot.lane.b32.xlu1 %v4247_v30, %s2201_s24  ;;  %v1344_v30 = vsel %vm1327_vm5, %v1311_v45, %v3252_v31  ;;  %v4251_v45 = vld [vmem:[#allocation49_spill] sm:$0xff] }
 0x184   : > { %1209 = vrot.lane.b32.xlu0 %v4249_v55, %s2205_s11  ;;  %v1377_v16 = vsel %vm1360_vm6, %v1344_v30, %v796_v47  ;;  %v4250_v47 = vld [vmem:[#allocation59_spill] sm:$0xff] }
 0x185   : > { %v1166_v11 = vpop.permute.xlu1 %1165  ;;  %v1410_v23 = vsel %vm1393_vm7, %v1377_v16, %v897_v61  ;;  %v4254_v30 = vld [vmem:[#allocation63_spill] sm:$0xff] }
 0x186   : > { %v1099_v2 = vpop.permute.xlu0 %1098  ;;  %v1493_v6 = vsel %vm1492_vm10, %v1460_v35, %v1166_v11  ;;  %v1443_v54 = vsel %vm1426_vm8, %v1410_v23, %v995_v49  ;;  %v2161_v35 = vld [vmem:[%s2251_s20 + $0x8] sm:$0xff] }
 0x187   : > { %912 = vrot.lane.b32.xlu1 %v4249_v55, %s2202_s25  ;;  %2063 = vmatprep.mubr.msk.f32.mxu0 %vm1537_vm11, %v1493_v6  ;;  %v1476_v31 = vsel %vm1459_vm9, %v1443_v54, %v1097_v20  ;;  %v1279_v55 = vsel %vm1261_vm2, %v3475_v57, %v4250_v47  ;;  %v4253_v20 = vld [vmem:[#allocation35_spill] sm:$0xff] }
 0x188   : > { %880 = vrot.lane.b32.xlu0 %v4245_v19, %s2202_s25  ;;  %v4252_v19 = vld [vmem:[#allocation56_spill] sm:$0xff]  ;;  %v1312_v11 = vsel %vm1294_vm3, %v1279_v55, %v3035_v38 }
 0x189   : > { %v3471_v28 = vpop.permute.xlu1 %801  ;;  %v1263_v49 = vsel %vm1261_vm2, %v2161_v35, %v4252_v19  ;;  %v1345_v16 = vsel %vm1327_vm5, %v1312_v11, %v3250_v52  ;;  %v2162_v35 = vld [vmem:[%s2251_s20 + $0x150] sm:$0xff]  ;;  %v2165_v19 = vld [vmem:[%s2251_s20 + $0x98] sm:$0xff] }
 0x18a   : > { %v1198_v5 = vpop.permute.xlu0 %1197  ;;  %v1296_v6 = vsel %vm1294_vm3, %v1263_v49, %v4254_v30  ;;  %v1378_v38 = vsel %vm1360_vm6, %v1345_v16, %v3402_v60 }
 0x18b   : > { %1211 = vrot.lane.b32.xlu1 %v4251_v45, %s2205_s11  ;;  %v1509_v61 = vsel %vm1492_vm10, %v1476_v31, %v1198_v5  ;;  %v1329_v54 = vsel %vm1327_vm5, %v1296_v6, %v3150_v37  ;;  %v1411_v47 = vsel %vm1393_vm7, %v1378_v38, %v3412_v34  ;;  %v2166_v38 = vld [vmem:[%s2251_s20 + $0x18] sm:$0xff] }
 0x18c   : > { %1179 = vrot.lane.b32.xlu0 %v4253_v20, %s2205_s11  ;;  %2087 = vmatprep.mubr.msk.f32.mxu1 %vm1537_vm11, %v1509_v61  ;;  %v1362_v5 = vsel %vm1360_vm6, %v1329_v54, %v3338_v27  ;;  %v1444_v37 = vsel %vm1426_vm8, %v1411_v47, %v997_v13  ;;  %v2163_v13 = vld [vmem:[%s2251_s20 + $0x90] sm:$0xff] }
 0x18d   : > { %v3495_v23 = vpop.permute.xlu1 %900  ;;  %v1395_v52 = vsel %vm1393_vm7, %v1362_v5, %v3414_v36  ;;  %v1477_v27 = vsel %vm1459_vm9, %v1444_v37, %v1099_v2  ;;  %v4256_v5 = vld [vmem:[#allocation50_spill] sm:$0xff] }
 0x18e   : > { %v869_v31 = vpop.permute.xlu0 %868  ;;  %v1428_v60 = vsel %vm1426_vm8, %v1395_v52, %v3424_v29  ;;  %v1264_v47 = vsel %vm1261_vm2, %v2166_v38, %v4256_v5  ;;  %v4257_v52 = vld [vmem:[#allocation38_spill] sm:$0xff] }
 0x18f   : > { %914 = vrot.lane.b32.xlu1 %v4251_v45, %s2202_s25  ;;  %v1461_v34 = vsel %vm1459_vm9, %v1428_v60, %v1067_v21  ;;  %v2164_v21 = vld [vmem:[%s2251_s20 + $0x158] sm:$0xff]  ;;  %v4258_v37 = vld [vmem:[#allocation66_spill] sm:$0xff] }
 0x190   : > { %882 = vrot.lane.b32.xlu0 %v4253_v20, %s2202_s25  ;;  %v4255_v20 = vld [vmem:[#allocation26_spill] sm:$0xff]  ;;  %v4259_v60 = vld [vmem:[#allocation25_spill] sm:$0xff] }
 0x191   : > { %v1200_v55 = vpop.permute.xlu1 %1199 }
 0x192   : > { %v1510_v45 = vsel %vm1492_vm10, %v1477_v27, %v1200_v55  ;;  %v1168_v61 = vpop.permute.xlu0 %1167 }
 0x193   : > { %v1494_v36 = vsel %vm1492_vm10, %v1461_v34, %v1168_v61  ;;  %1010 = vrot.lane.b32.xlu1 %v2162_v35, %s2203_s26  ;;  %2088 = vmatmul.mubr.msk.f32.vlgmr.msra.gmra.mxu1 %vm1537_vm11, %v1510_v45  ;;  %v3559_v61 = vld [vmem:[%s2251_s20 + $0xd8] sm:$0xff] }
 0x194   : > { %978 = vrot.lane.b32.xlu0 %v2163_v13, %s2203_s26  ;;  %2064 = vmatmul.mubr.msk.f32.vlgmr.msra.gmra.mxu0 %vm1537_vm11, %v1494_v36  ;;  %v4260_v36 = vld [vmem:[#allocation62_spill] sm:$0xff] }
 0x195   : > { %v3524_v29 = vpop.permute.xlu1 %902  ;;  %v1280_v35 = vsel %vm1261_vm2, %v3559_v61, %v4260_v36  ;;  %v4267_v36 = vld [vmem:[#allocation65_spill] sm:$0xff] }
 0x196   : > { %v3526_v2 = vpop.permute.xlu0 %870 }
 0x197   : > { %1012 = vrot.lane.b32.xlu1 %v2164_v21, %s2203_s26 }
 0x198   : > { %980 = vrot.lane.b32.xlu0 %v2165_v19, %s2203_s26 }
 0x199   : > { %v999_v49 = vpop.permute.xlu1 %998 }
 0x19a   : > { %v967_v11 = vpop.permute.xlu0 %966 }
 0x19b   : > { %1112 = vrot.lane.b32.xlu1 %v4255_v20, %s2204_s4 }
 0x19c   : > { %1080 = vrot.lane.b32.xlu0 %v4199_v56, %s2204_s4  ;;  %v1297_v56 = vsel %vm1294_vm3, %v1264_v47, %v4258_v37  ;;  %v3587_v37 = vld [vmem:[%s2251_s20 + $0xe0] sm:$0xff] }
 0x19d   : > { %v1001_v30 = vpop.permute.xlu1 %1000 }
 0x19e   : > { %v969_v6 = vpop.permute.xlu0 %968 }
 0x19f   : > { %1082 = vrot.lane.b32.xlu1 %v4198_v44, %s2204_s4  ;;  %v1330_v44 = vsel %vm1327_vm5, %v1297_v56, %v3166_v3  ;;  %v4261_v3 = vld [vmem:[#allocation55_spill] sm:$0xff] }
 0x1a0   : > { %815 = vrot.lane.b32.xlu0 %v4255_v20, %s2201_s24  ;;  %v1363_v55 = vsel %vm1360_vm6, %v1330_v44, %v3348_v9  ;;  %v1313_v9 = vsel %vm1294_vm3, %v1280_v35, %v3045_v4  ;;  %v2169_v44 = vld [vmem:[%s2251_s20 + $0x20] sm:$0xff] }
 0x1a1   : > { %v1101_v16 = vpop.permute.xlu1 %1100  ;;  %v1396_v45 = vsel %vm1393_vm7, %v1363_v55, %v869_v31  ;;  %v1346_v19 = vsel %vm1327_vm5, %v1313_v9, %v3260_v17  ;;  %v4265_v55 = vld [vmem:[#allocation3_spill] sm:$0xff] }
 0x1a2   : > { %v1069_v54 = vpop.permute.xlu0 %1068  ;;  %v1429_v13 = vsel %vm1426_vm8, %v1396_v45, %v967_v11  ;;  %v1379_v11 = vsel %vm1360_vm6, %v1346_v19, %v3443_v63  ;;  %v4262_v63 = vld [vmem:[#allocation61_spill] sm:$0xff] }
 0x1a3   : > { %1181 = vrot.lane.b32.xlu1 %v4257_v52, %s2205_s11  ;;  %v1462_v31 = vsel %vm1459_vm9, %v1429_v13, %v1069_v54  ;;  %v1412_v4 = vsel %vm1393_vm7, %v1379_v11, %v3495_v23  ;;  %v1281_v56 = vsel %vm1261_vm2, %v3587_v37, %v4262_v63  ;;  %v4263_v23 = vld [vmem:[#allocation53_spill] sm:$0xff] }
 0x1a4   : > { %1114 = vrot.lane.b32.xlu0 %v4259_v60, %s2204_s4  ;;  %v1445_v17 = vsel %vm1426_vm8, %v1412_v4, %v999_v49  ;;  %v1314_v45 = vsel %vm1294_vm3, %v1281_v56, %v4265_v55 }
 0x1a5   : > { %v1071_v27 = vpop.permute.xlu1 %1070  ;;  %v1478_v5 = vsel %vm1459_vm9, %v1445_v17, %v1101_v16  ;;  %v4266_v16 = vld [vmem:[#allocation37_spill] sm:$0xff]  ;;  %v1347_v13 = vsel %vm1327_vm5, %v1314_v45, %v3258_v1 }
 0x1a6   : > { %v3553_v34 = vpop.permute.xlu0 %803 }
 0x1a7   : > { %817 = vrot.lane.b32.xlu1 %v4259_v60, %s2201_s24 }
 0x1a8   : > { %1213 = vrot.lane.b32.xlu0 %v4261_v3, %s2205_s11 }
 0x1a9   : > { %v1170_v21 = vpop.permute.xlu1 %1169 }
 0x1aa   : > { %v1495_v20 = vsel %vm1492_vm10, %v1462_v31, %v1170_v21  ;;  %v1103_v38 = vpop.permute.xlu0 %1102  ;;  %v1380_v31 = vsel %vm1360_vm6, %v1347_v13, %v3471_v28  ;;  %v1365_v13 = vsel %vm1360_vm6, %v3184_v42, %v3356_v15  ;;  %v1381_v42 = vsel %vm1360_vm6, %v3272_v53, %v3553_v34  ;;  %v4274_v53 = vld [vmem:[#allocation57_spill] sm:$0xff]  ;;  %v4275_v34 = vld [vmem:[#allocation39_spill] sm:$0xff] }
 0x1ab   : > { %916 = vrot.lane.b32.xlu1 %v4261_v3, %s2202_s25  ;;  %2066 = vmatprep.mubr.msk.f32.mxu0 %vm1537_vm11, %v1495_v20  ;;  %v1413_v20 = vsel %vm1393_vm7, %v1380_v31, %v3524_v29 }
 0x1ac   : > { %884 = vrot.lane.b32.xlu0 %v4257_v52, %s2202_s25  ;;  %v4264_v52 = vld [vmem:[#allocation54_spill] sm:$0xff] }
 0x1ad   : > { %v3583_v54 = vpop.permute.xlu1 %805  ;;  %v1265_v49 = vsel %vm1261_vm2, %v2169_v44, %v4264_v52 }
 0x1ae   : > { %v1202_v47 = vpop.permute.xlu0 %1201  ;;  %v1298_v35 = vsel %vm1294_vm3, %v1265_v49, %v4267_v36  ;;  %v4270_v49 = vld [vmem:[#allocation10_spill] sm:$0xff]  ;;  %v4272_v36 = vld [vmem:[#allocation27_spill] sm:$0xff] }
 0x1af   : > { %v1511_v60 = vsel %vm1492_vm10, %v1478_v5, %v1202_v47  ;;  %1215 = vrot.lane.b32.xlu1 %v4263_v23, %s2205_s11  ;;  %v1331_v9 = vsel %vm1327_vm5, %v1298_v35, %v3164_v62  ;;  %v1446_v62 = vsel %vm1426_vm8, %v1413_v20, %v1001_v30  ;;  %v2171_v30 = vld [vmem:[%s2251_s20 + $0xa8] sm:$0xff]  ;;  %v2172_v47 = vld [vmem:[%s2251_s20 + $0x170] sm:$0xff]  ;;  %v4273_v20 = vld [vmem:[#allocation58_spill] sm:$0xff] }
 0x1b0   : > { %1183 = vrot.lane.b32.xlu0 %v4266_v16, %s2205_s11  ;;  %2090 = vmatprep.mubr.msk.f32.mxu1 %vm1537_vm11, %v1511_v60  ;;  %v1364_v19 = vsel %vm1360_vm6, %v1331_v9, %v3346_v33  ;;  %v1479_v33 = vsel %vm1459_vm9, %v1446_v62, %v1103_v38  ;;  %v4268_v60 = vld [vmem:[#allocation28_spill] sm:$0xff] }
 0x1b1   : > { %v905_v3 = vpop.permute.xlu1 %904  ;;  %v1397_v1 = vsel %vm1393_vm7, %v1364_v19, %v3526_v2  ;;  %v2170_v2 = vld [vmem:[%s2251_s20 + $0x168] sm:$0xff] }
 0x1b2   : > { %v873_v21 = vpop.permute.xlu0 %872  ;;  %v1430_v28 = vsel %vm1426_vm8, %v1397_v1, %v969_v6  ;;  %v1414_v15 = vsel %vm1393_vm7, %v1381_v42, %v905_v3  ;;  %v4280_v42 = vld [vmem:[#allocation42_spill] sm:$0xff] }
 0x1b3   : > { %918 = vrot.lane.b32.xlu1 %v4263_v23, %s2202_s25  ;;  %v1463_v29 = vsel %vm1459_vm9, %v1430_v28, %v1071_v27  ;;  %v2173_v27 = vld [vmem:[%s2251_s20 + $0xb0] sm:$0xff]  ;;  %v4269_v23 = vld [vmem:[#allocation11_spill] sm:$0xff]  ;;  %v1398_v31 = vsel %vm1393_vm7, %v1365_v13, %v873_v21  ;;  %v4278_v13 = vld [vmem:[#allocation13_spill] sm:$0xff] }
 0x1b4   : > { %886 = vrot.lane.b32.xlu0 %v4266_v16, %s2202_s25  ;;  %v4271_v16 = vld [vmem:[#allocation40_spill] sm:$0xff] }
 0x1b5   : > { %v1204_v11 = vpop.permute.xlu1 %1203 }
 0x1b6   : > { %v1512_v4 = vsel %vm1492_vm10, %v1479_v33, %v1204_v11  ;;  %v1172_v17 = vpop.permute.xlu0 %1171 }
 0x1b7   : > { %v1496_v5 = vsel %vm1492_vm10, %v1463_v29, %v1172_v17  ;;  %1014 = vrot.lane.b32.xlu1 %v2170_v2, %s2203_s26  ;;  %2091 = vmatmul.mubr.msk.f32.gmra.mxu1 %vm1537_vm11, %v1512_v4 }
 0x1b8   : > { %982 = vrot.lane.b32.xlu0 %v2171_v30, %s2203_s26  ;;  %2067 = vmatmul.mubr.msk.f32.gmra.mxu0 %vm1537_vm11, %v1496_v5  ;;  %v1382_v5 = vsel %vm1360_vm6, %v3268_v59, %v3583_v54  ;;  %v1366_v30 = vsel %vm1360_vm6, %v3180_v25, %v3354_v0 }
 0x1b9   : > { %v907_v6 = vpop.permute.xlu1 %906 }
 0x1ba   : > { %v875_v38 = vpop.permute.xlu0 %874 }
 0x1bb   : > { %1016 = vrot.lane.b32.xlu1 %v2172_v47, %s2203_s26  ;;  %v1415_v47 = vsel %vm1393_vm7, %v1382_v5, %v907_v6 }
 0x1bc   : > { %984 = vrot.lane.b32.xlu0 %v2173_v27, %s2203_s26  ;;  %v1399_v27 = vsel %vm1393_vm7, %v1366_v30, %v875_v38  ;;  %v4276_v38 = vld [vmem:[#allocation68_spill] sm:$0xff] }
 0x1bd   : > { %v1003_v63 = vpop.permute.xlu1 %1002 }
 0x1be   : > { %v971_v56 = vpop.permute.xlu0 %970  ;;  %v1447_v21 = vsel %vm1426_vm8, %v1414_v15, %v1003_v63 }
 0x1bf   : > { %1116 = vrot.lane.b32.xlu1 %v4268_v60, %s2204_s4  ;;  %v1431_v19 = vsel %vm1426_vm8, %v1398_v31, %v971_v56 }
 0x1c0   : > { %1084 = vrot.lane.b32.xlu0 %v4269_v23, %s2204_s4  ;;  %v4277_v23 = vld [vmem:[#allocation67_spill] sm:$0xff] }
 0x1c1   : > { %v1005_v44 = vpop.permute.xlu1 %1004 }
 0x1c2   : > { %v973_v52 = vpop.permute.xlu0 %972  ;;  %v1448_v63 = vsel %vm1426_vm8, %v1415_v47, %v1005_v44  ;;  %v759_v44 = vrot.slane %v4277_v23, 1 }
 0x1c3   : > { %1086 = vrot.lane.b32.xlu1 %v4270_v49, %s2204_s4  ;;  %v1432_v56 = vsel %vm1426_vm8, %v1399_v27, %v973_v52  ;;  %v758_v52 = vrot.slane %v4276_v38, 1 }
 0x1c4   : > { %819 = vrot.lane.b32.xlu0 %v4268_v60, %s2201_s24 }
 0x1c5   : > { %v1105_v55 = vpop.permute.xlu1 %1104 }
 0x1c6   : > { %v1073_v45 = vpop.permute.xlu0 %1072  ;;  %v1480_v29 = vsel %vm1459_vm9, %v1447_v21, %v1105_v55 }
 0x1c7   : > { %1185 = vrot.lane.b32.xlu1 %v4271_v16, %s2205_s11  ;;  %v1464_v1 = vsel %vm1459_vm9, %v1431_v19, %v1073_v45  ;;  %v760_v45 = vsel %vm305_vm0, %v758_v52, %v759_v44 }
 0x1c8   : > { %1118 = vrot.lane.b32.xlu0 %v4272_v36, %s2204_s4 }
 0x1c9   : > { %v1075_v35 = vpop.permute.xlu1 %1074 }
 0x1ca   : > { %v3652_v9 = vpop.permute.xlu0 %807  ;;  %v1465_v60 = vsel %vm1459_vm9, %v1432_v56, %v1075_v35  ;;  %v253_v35 = vld [vmem:[%s2251_s20 + $0x190] sm:$0x3] }
 0x1cb   : > { %821 = vrot.lane.b32.xlu1 %v4272_v36, %s2201_s24  ;;  %v761_v31 = vrot.slane %v253_v35, 1 }
 0x1cc   : > { %1217 = vrot.lane.b32.xlu0 %v4273_v20, %s2205_s11 }
 0x1cd   : > { %v1174_v62 = vpop.permute.xlu1 %1173 }
 0x1ce   : > { %v1497_v28 = vsel %vm1492_vm10, %v1464_v1, %v1174_v62  ;;  %v1107_v33 = vpop.permute.xlu0 %1106  ;;  %v859_v1 = vrot.slane %v4276_v38, 2 }
 0x1cf   : > { %920 = vrot.lane.b32.xlu1 %v4273_v20, %s2202_s25  ;;  %2069 = vmatprep.mubr.msk.f32.mxu0 %vm1537_vm11, %v1497_v28  ;;  %v1481_v59 = vsel %vm1459_vm9, %v1448_v63, %v1107_v33  ;;  %v4279_v20 = vld [vmem:[#allocation12_spill] sm:$0xff]  ;;  %v762_v28 = vsel %vm305_vm0, %v759_v44, %v761_v31  ;;  %v254_v44 = vld [vmem:[%s2251_s20 + $0x198] sm:$0xff] }
 0x1d0   : > { %888 = vrot.lane.b32.xlu0 %v4271_v16, %s2202_s25 }
 0x1d1   : > { %v3672_v11 = vpop.permute.xlu1 %809 }
 0x1d2   : > { %v1206_v4 = vpop.permute.xlu0 %1205 }
 0x1d3   : > { %v1513_v17 = vsel %vm1492_vm10, %v1480_v29, %v1206_v4  ;;  %1219 = vrot.lane.b32.xlu1 %v4274_v53, %s2205_s11  ;;  %v1367_v29 = vsel %vm1360_vm6, %v3196_v8, %v3364_v10  ;;  %v1383_v8 = vsel %vm1360_vm6, %v3284_v12, %v3652_v9  ;;  %v4281_v9 = vld [vmem:[#allocation41_spill] sm:$0xff] }
 0x1d4   : > { %1187 = vrot.lane.b32.xlu0 %v4275_v34, %s2205_s11  ;;  %2093 = vmatprep.mubr.msk.f32.mxu1 %vm1537_vm11, %v1513_v17 }
 0x1d5   : > { %v909_v3 = vpop.permute.xlu1 %908 }
 0x1d6   : > { %v877_v2 = vpop.permute.xlu0 %876  ;;  %v1416_v10 = vsel %vm1393_vm7, %v1383_v8, %v909_v3 }
 0x1d7   : > { %922 = vrot.lane.b32.xlu1 %v4274_v53, %s2202_s25  ;;  %v1400_v17 = vsel %vm1393_vm7, %v1367_v29, %v877_v2 }
 0x1d8   : > { %890 = vrot.lane.b32.xlu0 %v4275_v34, %s2202_s25  ;;  %v862_v34 = vrot.slane %v253_v35, 2 }
 0x1d9   : > { %v1208_v54 = vpop.permute.xlu1 %1207 }
 0x1da   : > { %v1514_v25 = vsel %vm1492_vm10, %v1481_v59, %v1208_v54  ;;  %v1176_v0 = vpop.permute.xlu0 %1175 }
 0x1db   : > { %v1498_v6 = vsel %vm1492_vm10, %v1465_v60, %v1176_v0  ;;  %1018 = vrot.lane.b32.xlu1 %v4276_v38, %s2203_s26  ;;  %2094 = vmatmul.mubr.msk.f32.gmra.mxu1 %vm1537_vm11, %v1514_v25  ;;  %v1384_v60 = vsel %vm1360_vm6, %v3280_v14, %v3672_v11  ;;  %v1368_v0 = vsel %vm1360_vm6, %v3192_v43, %v3362_v50 }
 0x1dc   : > { %986 = vrot.lane.b32.xlu0 %v3449_v32, %s2203_s26  ;;  %2070 = vmatmul.mubr.msk.f32.gmra.mxu0 %vm1537_vm11, %v1498_v6 }
 0x1dd   : > { %v911_v49 = vpop.permute.xlu1 %910 }
 0x1de   : > { %v879_v55 = vpop.permute.xlu0 %878  ;;  %v1417_v6 = vsel %vm1393_vm7, %v1384_v60, %v911_v49 }
 0x1df   : > { %1020 = vrot.lane.b32.xlu1 %v4277_v23, %s2203_s26  ;;  %v1401_v38 = vsel %vm1393_vm7, %v1368_v0, %v879_v55 }
 0x1e0   : > { %988 = vrot.lane.b32.xlu0 %v3475_v57, %s2203_s26  ;;  %v860_v57 = vrot.slane %v4277_v23, 2 }
 0x1e1   : > { %v1007_v16 = vpop.permute.xlu1 %1006 }
 0x1e2   : > { %v975_v36 = vpop.permute.xlu0 %974  ;;  %v861_v21 = vsel %vm482_vm1, %v859_v1, %v860_v57  ;;  %v863_v2 = vsel %vm482_vm1, %v860_v57, %v862_v34  ;;  %v1449_v63 = vsel %vm1426_vm8, %v1416_v10, %v1007_v16  ;;  %v1059_v16 = vrot.slane %v254_v44, 1 }
 0x1e3   : > { %1120 = vrot.lane.b32.xlu1 %v760_v45, %s2204_s4  ;;  %v1433_v53 = vsel %vm1426_vm8, %v1400_v17, %v975_v36  ;;  %v1160_v1 = vrot.slane %v254_v44, 2  ;;  %v1369_v17 = vsel %vm1360_vm6, %v3208_v58, %v3372_v24 }
 0x1e4   : > { %1088 = vrot.lane.b32.xlu0 %v4278_v13, %s2204_s4  ;;  %v256_v13 = vld [vmem:[%s2251_s20 + $0x1a8] sm:$0x3] }
 0x1e5   : > { %v1009_v32 = vpop.permute.xlu1 %1008 }
 0x1e6   : > { %v977_v19 = vpop.permute.xlu0 %976  ;;  %v1450_v23 = vsel %vm1426_vm8, %v1417_v6, %v1009_v32 }
 0x1e7   : > { %1090 = vrot.lane.b32.xlu1 %v4279_v20, %s2204_s4  ;;  %v1434_v14 = vsel %vm1426_vm8, %v1401_v38, %v977_v19  ;;  %v1062_v19 = vrot.slane %v256_v13, 1 }
 0x1e8   : > { %823 = vrot.lane.b32.xlu0 %v760_v45, %s2201_s24  ;;  %v255_v45 = vld [vmem:[%s2251_s20 + $0x1a0] sm:$0xff] }
 0x1e9   : > { %v1109_v62 = vpop.permute.xlu1 %1108  ;;  %v1060_v36 = vrot.slane %v255_v45, 1 }
 0x1ea   : > { %v1077_v33 = vpop.permute.xlu0 %1076  ;;  %v1482_v59 = vsel %vm1459_vm9, %v1449_v63, %v1109_v62 }
 0x1eb   : > { %1189 = vrot.lane.b32.xlu1 %v4280_v42, %s2205_s11  ;;  %v1466_v5 = vsel %vm1459_vm9, %v1433_v53, %v1077_v33  ;;  %v1061_v31 = vsel %vm305_vm0, %v1059_v16, %v1060_v36  ;;  %v1063_v62 = vsel %vm305_vm0, %v1060_v36, %v1062_v19 }
 0x1ec   : > { %1122 = vrot.lane.b32.xlu0 %v762_v28, %s2204_s4 }
 0x1ed   : > { %v1079_v15 = vpop.permute.xlu1 %1078 }
 0x1ee   : > { %v3729_v4 = vpop.permute.xlu0 %811  ;;  %v1467_v43 = vsel %vm1459_vm9, %v1434_v14, %v1079_v15 }
 0x1ef   : > { %825 = vrot.lane.b32.xlu1 %v762_v28, %s2201_s24  ;;  %v1385_v58 = vsel %vm1360_vm6, %v3296_v46, %v3729_v4 }
 0x1f0   : > { %1221 = vrot.lane.b32.xlu0 %v861_v21, %s2205_s11 }
 0x1f1   : > { %v1178_v30 = vpop.permute.xlu1 %1177 }
 0x1f2   : > { %v1499_v47 = vsel %vm1492_vm10, %v1466_v5, %v1178_v30  ;;  %v1111_v27 = vpop.permute.xlu0 %1110 }
 0x1f3   : > { %924 = vrot.lane.b32.xlu1 %v861_v21, %s2202_s25  ;;  %2072 = vmatprep.mubr.msk.f32.mxu0 %vm1537_vm11, %v1499_v47  ;;  %v1483_v11 = vsel %vm1459_vm9, %v1450_v23, %v1111_v27 }
 0x1f4   : > { %892 = vrot.lane.b32.xlu0 %v4280_v42, %s2202_s25  ;;  %v1163_v42 = vrot.slane %v256_v13, 2 }
 0x1f5   : > { %v3747_v56 = vpop.permute.xlu1 %813 }
 0x1f6   : > { %v1210_v54 = vpop.permute.xlu0 %1209  ;;  %v1386_v46 = vsel %vm1360_vm6, %v3292_v41, %v3747_v56 }
 0x1f7   : > { %v1515_v12 = vsel %vm1492_vm10, %v1482_v59, %v1210_v54  ;;  %1223 = vrot.lane.b32.xlu1 %v863_v2, %s2205_s11  ;;  %v1370_v59 = vsel %vm1360_vm6, %v3204_v51, %v3370_v26 }
 0x1f8   : > { %1191 = vrot.lane.b32.xlu0 %v4281_v9, %s2205_s11  ;;  %2096 = vmatprep.mubr.msk.f32.mxu1 %vm1537_vm11, %v1515_v12 }
 0x1f9   : > { %v3755_v3 = vpop.permute.xlu1 %912 }
 0x1fa   : > { %v881_v25 = vpop.permute.xlu0 %880  ;;  %v1418_v24 = vsel %vm1393_vm7, %v1385_v58, %v3755_v3 }
 0x1fb   : > { %926 = vrot.lane.b32.xlu1 %v863_v2, %s2202_s25 }
 0x1fc   : > { %894 = vrot.lane.b32.xlu0 %v4281_v9, %s2202_s25 }
 0x1fd   : > { %v1212_v52 = vpop.permute.xlu1 %1211 }
 0x1fe   : > { %v1516_v50 = vsel %vm1492_vm10, %v1483_v11, %v1212_v52  ;;  %v1180_v49 = vpop.permute.xlu0 %1179 }
 0x1ff   : > { %v1500_v55 = vsel %vm1492_vm10, %v1467_v43, %v1180_v49  ;;  %1022 = vrot.lane.b32.xlu1 %v254_v44, %s2203_s26  ;;  %2097 = vmatmul.mubr.msk.f32.gmra.mxu1 %vm1537_vm11, %v1516_v50  ;;  %v1371_v43 = vsel %vm1360_vm6, %v3220_v39, %v3380_v22 }
 0x200   : > { %990 = vrot.lane.b32.xlu0 %v3559_v61, %s2203_s26  ;;  %2073 = vmatmul.mubr.msk.f32.gmra.mxu0 %vm1537_vm11, %v1500_v55  ;;  %v1161_v61 = vrot.slane %v255_v45, 2 }
 0x201   : > { %v915_v35 = vpop.permute.xlu1 %914 }
 0x202   : > { %v883_v32 = vpop.permute.xlu0 %882  ;;  %v1419_v54 = vsel %vm1393_vm7, %v1386_v46, %v915_v35 }
 0x203   : > { %1024 = vrot.lane.b32.xlu1 %v255_v45, %s2203_s26  ;;  %v1403_v12 = vsel %vm1393_vm7, %v1370_v59, %v883_v32  ;;  %v4282_v32 = vld [vmem:[#allocation14_spill] sm:$0xff] }
 0x204   : > { %992 = vrot.lane.b32.xlu0 %v3587_v37, %s2203_s26  ;;  %v1162_v37 = vsel %vm482_vm1, %v1160_v1, %v1161_v61 }
 0x205   : > { %v1011_v20 = vpop.permute.xlu1 %1010 }
 0x206   : > { %v979_v57 = vpop.permute.xlu0 %978  ;;  %v1451_v27 = vsel %vm1426_vm8, %v1418_v24, %v1011_v20 }
 0x207   : > { %1124 = vrot.lane.b32.xlu1 %v1061_v31, %s2204_s4 }
 0x208   : > { %1092 = vrot.lane.b32.xlu0 %v4206_v40, %s2204_s4  ;;  %v1164_v40 = vsel %vm482_vm1, %v1161_v61, %v1163_v42  ;;  %v4285_v42 = vld [vmem:[#allocation4_spill] sm:$0xff] }
 0x209   : > { %v1013_v28 = vpop.permute.xlu1 %1012 }
 0x20a   : > { %v981_v33 = vpop.permute.xlu0 %980  ;;  %v1452_v9 = vsel %vm1426_vm8, %v1419_v54, %v1013_v28 }
 0x20b   : > { %1126 = vrot.lane.b32.xlu1 %v1063_v62, %s2204_s4  ;;  %v1436_v3 = vsel %vm1426_vm8, %v1403_v12, %v981_v33  ;;  %v4283_v62 = vld [vmem:[#allocation9_spill] sm:$0xff] }
 0x20c   : > { %1094 = vrot.lane.b32.xlu0 %v4205_v48, %s2204_s4  ;;  %v1402_v48 = vsel %vm1393_vm7, %v1369_v17, %v881_v25 }
 0x20d   : > { %v1113_v15 = vpop.permute.xlu1 %1112  ;;  %v1435_v34 = vsel %vm1426_vm8, %v1402_v48, %v979_v57 }
 0x20e   : > { %v1081_v21 = vpop.permute.xlu0 %1080 }
 0x20f   : > { %1225 = vrot.lane.b32.xlu1 %v1162_v37, %s2205_s11  ;;  %v1468_v5 = vsel %vm1459_vm9, %v1435_v34, %v1081_v21  ;;  %v4284_v37 = vld [vmem:[#allocation30_spill] sm:$0xff] }
 0x210   : > { %1193 = vrot.lane.b32.xlu0 %v2719_v18, %s2205_s11 }
 0x211   : > { %v1083_v29 = vpop.permute.xlu1 %1082 }
 0x212   : > { %v816_v53 = vpop.permute.xlu0 %815  ;;  %v1469_v0 = vsel %vm1459_vm9, %v1436_v3, %v1083_v29 }
 0x213   : > { %1227 = vrot.lane.b32.xlu1 %v1164_v40, %s2205_s11  ;;  %v1387_v31 = vsel %vm1360_vm6, %v4282_v32, %v816_v53 }
 0x214   : > { %1195 = vrot.lane.b32.xlu0 %v2714_v7, %s2205_s11  ;;  %v1484_v7 = vsel %vm1459_vm9, %v1451_v27, %v1113_v15  ;;  %v1372_v15 = vsel %vm1360_vm6, %v4285_v42, %v4284_v37 }
 0x215   : > { %v1182_v18 = vpop.permute.xlu1 %1181 }
 0x216   : > { %v1501_v30 = vsel %vm1492_vm10, %v1468_v5, %v1182_v18  ;;  %v1115_v47 = vpop.permute.xlu0 %1114 }
 0x217   : > { %2075 = vmatprep.mubr.msk.f32.mxu0 %vm1537_vm11, %v1501_v30  ;;  %v1485_v60 = vsel %vm1459_vm9, %v1452_v9, %v1115_v47 }
 0x219   : > { %v818_v8 = vpop.permute.xlu1 %817 }
 0x21a   : > { %v1214_v10 = vpop.permute.xlu0 %1213  ;;  %v1388_v28 = vsel %vm1360_vm6, %v4283_v62, %v818_v8 }
 0x21b   : > { %v1517_v2 = vsel %vm1492_vm10, %v1484_v7, %v1214_v10  ;;  %v3872_v7 = vld [vmem:[%s4016_s2] ss:$0 sm:$0xff] }
 0x21c   : > { %2099 = vmatprep.mubr.msk.f32.mxu1 %vm1537_vm11, %v1517_v2 }
 0x21d   : > { %v917_v63 = vpop.permute.xlu1 %916 }
 0x21e   : > { %v885_v4 = vpop.permute.xlu0 %884  ;;  %v1420_v19 = vsel %vm1393_vm7, %v1387_v31, %v917_v63  ;;  %v4290_v31 = vld [vmem:[#allocation16_spill] sm:$0xff] }
 0x21f   : > { %v1404_v49 = vsel %vm1393_vm7, %v1371_v43, %v885_v4 }
 0x221   : > { %v1216_v25 = vpop.permute.xlu1 %1215 }
 0x222   : > { %v1518_v41 = vsel %vm1492_vm10, %v1485_v60, %v1216_v25  ;;  %v1184_v56 = vpop.permute.xlu0 %1183 }
 0x223   : > { %v1502_v6 = vsel %vm1492_vm10, %v1469_v0, %v1184_v56  ;;  %2100 = vmatmul.mubr.msk.f32.gmra.mxu1 %vm1537_vm11, %v1518_v41  ;;  %v4286_v0 = vld [vmem:[#allocation44_spill] sm:$0xff]  ;;  %v4287_v41 = vld [vmem:[#allocation6_spill] sm:$0xff] }
 0x224   : > { %2076 = vmatmul.mubr.msk.f32.gmra.mxu0 %vm1537_vm11, %v1502_v6  ;;  %v1373_v56 = vsel %vm1360_vm6, %v4287_v41, %v4286_v0  ;;  %v4295_v41 = vld [vmem:[#allocation2_spill] sm:$0xff] }
 0x225   : > { %v919_v51 = vpop.permute.xlu1 %918 }
 0x226   : > { %v887_v26 = vpop.permute.xlu0 %886  ;;  %v1421_v21 = vsel %vm1393_vm7, %v1388_v28, %v919_v51 }
 0x227   : > { %v1405_v40 = vsel %vm1393_vm7, %v1372_v15, %v887_v26 }
 0x229   : > { %v1015_v38 = vpop.permute.xlu1 %1014 }
 0x22a   : > { %v983_v23 = vpop.permute.xlu0 %982  ;;  %v1453_v39 = vsel %vm1426_vm8, %v1420_v19, %v1015_v38  ;;  %v4291_v19 = vld [vmem:[#allocation5_spill] sm:$0xff] }
 0x22b   : > { %v1437_v55 = vsel %vm1426_vm8, %v1404_v49, %v983_v23 }
 0x22d   : > { %v1017_v44 = vpop.permute.xlu1 %1016 }
 0x22e   : > { %v985_v14 = vpop.permute.xlu0 %984  ;;  %v1454_v29 = vsel %vm1426_vm8, %v1421_v21, %v1017_v44 }
 0x22f   : > { %v1438_v17 = vsel %vm1426_vm8, %v1405_v40, %v985_v14 }
 0x231   : > { %v1117_v11 = vpop.permute.xlu1 %1116 }
 0x232   : > { %v1085_v52 = vpop.permute.xlu0 %1084  ;;  %v1486_v20 = vsel %vm1459_vm9, %v1453_v39, %v1117_v11  ;;  %v4288_v11 = vld [vmem:[#allocation24_spill] sm:$0xff]  ;;  %v1374_v39 = vsel %vm1360_vm6, %v4291_v19, %v4290_v31 }
 0x233   : > { %v1470_v16 = vsel %vm1459_vm9, %v1437_v55, %v1085_v52 }
 0x235   : > { %v1087_v45 = vpop.permute.xlu1 %1086 }
 0x236   : > { %v3837_v50 = vpop.permute.xlu0 %819  ;;  %v1471_v34 = vsel %vm1459_vm9, %v1438_v17, %v1087_v45 }
 0x237   : > { %v1389_v52 = vsel %vm1360_vm6, %v4288_v11, %v3837_v50 }
 0x239   : > { %v1186_v36 = vpop.permute.xlu1 %1185 }
 0x23a   : > { %v1503_v35 = vsel %vm1492_vm10, %v1470_v16, %v1186_v36  ;;  %v1119_v13 = vpop.permute.xlu0 %1118 }
 0x23b   : > { %2078 = vmatprep.mubr.msk.f32.mxu0 %vm1537_vm11, %v1503_v35  ;;  %v1487_v53 = vsel %vm1459_vm9, %v1454_v29, %v1119_v13  ;;  %v4289_v13 = vld [vmem:[#allocation15_spill] sm:$0xff] }
 0x23d   : > { %v3848_v22 = vpop.permute.xlu1 %821 }
 0x23e   : > { %v1218_v57 = vpop.permute.xlu0 %1217  ;;  %v1390_v32 = vsel %vm1360_vm6, %v4289_v13, %v3848_v22 }
 0x23f   : > { %v1519_v1 = vsel %vm1492_vm10, %v1486_v20, %v1218_v57 }
 0x240   : > { %2102 = vmatprep.mubr.msk.f32.mxu1 %vm1537_vm11, %v1519_v1 }
 0x241   : > { %v921_v61 = vpop.permute.xlu1 %920 }
 0x242   : > { %v889_v33 = vpop.permute.xlu0 %888  ;;  %v1422_v45 = vsel %vm1393_vm7, %v1389_v52, %v921_v61 }
 0x243   : > { %v1406_v51 = vsel %vm1393_vm7, %v1373_v56, %v889_v33 }
 0x245   : > { %v1220_v48 = vpop.permute.xlu1 %1219 }
 0x246   : > { %v1520_v5 = vsel %vm1492_vm10, %v1487_v53, %v1220_v48  ;;  %v1188_v18 = vpop.permute.xlu0 %1187 }
 0x247   : > { %v1504_v30 = vsel %vm1492_vm10, %v1471_v34, %v1188_v18  ;;  %2103 = vmatmul.mubr.msk.f32.gmra.mxu1 %vm1537_vm11, %v1520_v5 }
 0x248   : > { %2079 = vmatmul.mubr.msk.f32.gmra.mxu0 %vm1537_vm11, %v1504_v30 }
 0x249   : > { %v923_v47 = vpop.permute.xlu1 %922 }
 0x24a   : > { %v891_v58 = vpop.permute.xlu0 %890  ;;  %v1423_v20 = vsel %vm1393_vm7, %v1390_v32, %v923_v47 }
 0x24b   : > { %v1407_v57 = vsel %vm1393_vm7, %v1374_v39, %v891_v58 }
 0x24d   : > { %v1019_v24 = vpop.permute.xlu1 %1018 }
 0x24e   : > { %v987_v27 = vpop.permute.xlu0 %986  ;;  %v1455_v43 = vsel %vm1426_vm8, %v1422_v45, %v1019_v24 }
 0x24f   : > { %v1439_v26 = vsel %vm1426_vm8, %v1406_v51, %v987_v27 }
 0x251   : > { %v1021_v8 = vpop.permute.xlu1 %1020 }
 0x252   : > { %v989_v10 = vpop.permute.xlu0 %988  ;;  %v1456_v1 = vsel %vm1426_vm8, %v1423_v20, %v1021_v8 }
 0x253   : > { %v2089_v2 = vpop.f32.mrf.mxu1  ;;  %v1440_v61 = vsel %vm1426_vm8, %v1407_v57, %v989_v10 }
 0x254   : > { %v2065_v63 = vpop.f32.mrf.mxu0  ;;  %v1790_v46 = vadd.f32 %v2089_v2, %v3872_v7  ;;  %v4292_v2 = vld [vmem:[#allocation17_spill] sm:$0xff] }
 0x255   : > { %v1710_v4 = vadd.f32 %v2065_v63, %v3872_v7  ;;  %v1121_v59 = vpop.permute.xlu1 %1120  ;;  %v1784_v54 = vpop.f32.mrf.mxu1 }
 0x256   : > { %1880 = vst [vmem:[%s3877_s21 + $0x88] sm:$0xff] %v1790_v46  ;;  %v1704_v12 = vpop.f32.mrf.mxu0  ;;  %v1785_v9 = vadd.f32 %v3872_v7, %v1784_v54  ;;  %v1089_v3 = vpop.permute.xlu0 %1088  ;;  %v1488_v55 = vsel %vm1459_vm9, %v1455_v43, %v1121_v59  ;;  %v4294_v59 = vld [vmem:[#allocation8_spill] sm:$0xff] }
 0x257   : > { %1864 = vst [vmem:[%s3877_s21 + $0x8] sm:$0xff] %v1710_v4  ;;  %v1705_v60 = vadd.f32 %v3872_v7, %v1704_v12  ;;  %v1472_v38 = vsel %vm1459_vm9, %v1439_v26, %v1089_v3  ;;  %v4293_v4 = vld [vmem:[#allocation29_spill] sm:$0xff] }
 0x258   : > { %1879 = vst [vmem:[%s3877_s21 + $0x80] sm:$0xff] %v1785_v9  ;;  %v1375_v54 = vsel %vm1360_vm6, %v4294_v59, %v4293_v4 }
 0x259   : > { %1863 = vst [vmem:[%s3877_s21] sm:$0xff] %v1705_v60  ;;  %v1091_v25 = vpop.permute.xlu1 %1090 }
 0x25a   : > { %v824_v6 = vpop.permute.xlu0 %823  ;;  %v1473_v33 = vsel %vm1459_vm9, %v1440_v61, %v1091_v25 }
 0x25b   : > { %v1391_v63 = vsel %vm1360_vm6, %v4292_v2, %v824_v6 }
 0x25d   : > { %v1190_v23 = vpop.permute.xlu1 %1189 }
 0x25e   : > { %v1505_v44 = vsel %vm1492_vm10, %v1472_v38, %v1190_v23  ;;  %v1123_v14 = vpop.permute.xlu0 %1122  ;;  %v4296_v38 = vld [vmem:[#allocation43_spill] sm:$0xff] }
 0x25f   : > { %2081 = vmatprep.mubr.msk.f32.mxu0 %vm1537_vm11, %v1505_v44  ;;  %v1489_v62 = vsel %vm1459_vm9, %v1456_v1, %v1123_v14  ;;  %v4297_v23 = vld [vmem:[#allocation7_spill] sm:$0xff] }
 0x260   : > { %v1376_v44 = vsel %vm1360_vm6, %v4297_v23, %v4296_v38 }
 0x261   : > { %v826_v49 = vpop.permute.xlu1 %825 }
 0x262   : > { %v1222_v16 = vpop.permute.xlu0 %1221  ;;  %v1392_v56 = vsel %vm1360_vm6, %v4295_v41, %v826_v49 }
 0x263   : > { %v1521_v36 = vsel %vm1492_vm10, %v1488_v55, %v1222_v16 }
 0x264   : > { %2105 = vmatprep.mubr.msk.f32.mxu1 %vm1537_vm11, %v1521_v36 }
 0x265   : > { %v925_v35 = vpop.permute.xlu1 %924 }
 0x266   : > { %v893_v50 = vpop.permute.xlu0 %892  ;;  %v1424_v12 = vsel %vm1393_vm7, %v1391_v63, %v925_v35 }
 0x267   : > { %v1408_v9 = vsel %vm1393_vm7, %v1375_v54, %v893_v50 }
 0x269   : > { %v1224_v28 = vpop.permute.xlu1 %1223 }
 0x26a   : > { %v1522_v22 = vsel %vm1492_vm10, %v1489_v62, %v1224_v28  ;;  %v1192_v37 = vpop.permute.xlu0 %1191 }
 0x26b   : > { %v1506_v42 = vsel %vm1492_vm10, %v1473_v33, %v1192_v37  ;;  %2106 = vmatmul.mubr.msk.f32.gmra.mxu1 %vm1537_vm11, %v1522_v22 }
 0x26c   : > { %2082 = vmatmul.mubr.msk.f32.gmra.mxu0 %vm1537_vm11, %v1506_v42 }
 0x26d   : > { %v927_v15 = vpop.permute.xlu1 %926 }
 0x26e   : > { %v895_v21 = vpop.permute.xlu0 %894  ;;  %v1425_v14 = vsel %vm1393_vm7, %v1392_v56, %v927_v15 }
 0x26f   : > { %v1409_v52 = vsel %vm1393_vm7, %v1376_v44, %v895_v21 }
 0x271   : > { %v1023_v40 = vpop.permute.xlu1 %1022 }
 0x272   : > { %v991_v29 = vpop.permute.xlu0 %990  ;;  %v1457_v3 = vsel %vm1426_vm8, %v1424_v12, %v1023_v40 }
 0x273   : > { %v1441_v60 = vsel %vm1426_vm8, %v1408_v9, %v991_v29 }
 0x275   : > { %v1025_v17 = vpop.permute.xlu1 %1024 }
 0x276   : > { %v993_v53 = vpop.permute.xlu0 %992  ;;  %v1458_v45 = vsel %vm1426_vm8, %v1425_v14, %v1025_v17 }
 0x277   : > { %v2092_v48 = vpop.f32.mrf.mxu1  ;;  %v1442_v43 = vsel %vm1426_vm8, %v1409_v52, %v993_v53 }
 0x278   : > { %v2068_v34 = vpop.f32.mrf.mxu0  ;;  %v1800_v5 = vadd.f32 %v2092_v48, %v3872_v7 }
 0x279   : > { %v1720_v18 = vadd.f32 %v2068_v34, %v3872_v7  ;;  %v1125_v30 = vpop.permute.xlu1 %1124  ;;  %v1794_v47 = vpop.f32.mrf.mxu1 }
 0x27a   : > { %1882 = vst [vmem:[%s3877_s21 + $0x98] sm:$0xff] %v1800_v5  ;;  %v1714_v58 = vpop.f32.mrf.mxu0  ;;  %v1795_v24 = vadd.f32 %v3872_v7, %v1794_v47  ;;  %v1093_v27 = vpop.permute.xlu0 %1092  ;;  %v1490_v25 = vsel %vm1459_vm9, %v1457_v3, %v1125_v30 }
 0x27b   : > { %1866 = vst [vmem:[%s3877_s21 + $0x18] sm:$0xff] %v1720_v18  ;;  %v1715_v8 = vadd.f32 %v3872_v7, %v1714_v58  ;;  %v1474_v6 = vsel %vm1459_vm9, %v1441_v60, %v1093_v27 }
 0x27c   : > { %1881 = vst [vmem:[%s3877_s21 + $0x90] sm:$0xff] %v1795_v24 }
 0x27d   : > { %1865 = vst [vmem:[%s3877_s21 + $0x10] sm:$0xff] %v1715_v8  ;;  %v1127_v10 = vpop.permute.xlu1 %1126 }
 0x27e   : > { %v1095_v46 = vpop.permute.xlu0 %1094  ;;  %v1491_v49 = vsel %vm1459_vm9, %v1458_v45, %v1127_v10 }
 0x27f   : > { %v1475_v16 = vsel %vm1459_vm9, %v1442_v43, %v1095_v46 }
 0x281   : > { %v1226_v0 = vpop.permute.xlu1 %1225 }
 0x282   : > { %v1523_v51 = vsel %vm1492_vm10, %v1490_v25, %v1226_v0  ;;  %v1194_v26 = vpop.permute.xlu0 %1193 }
 0x283   : > { %v1507_v11 = vsel %vm1492_vm10, %v1474_v6, %v1194_v26  ;;  %2108 = vmatprep.mubr.msk.f32.mxu1 %vm1537_vm11, %v1523_v51 }
 0x284   : > { %2084 = vmatprep.mubr.msk.f32.mxu0 %vm1537_vm11, %v1507_v11 }
 0x285   : > { %v1228_v55 = vpop.permute.xlu1 %1227 }
 0x286   : > { %v1524_v36 = vsel %vm1492_vm10, %v1491_v49, %v1228_v55  ;;  %v1196_v35 = vpop.permute.xlu0 %1195 }
 0x287   : > { %v1508_v13 = vsel %vm1492_vm10, %v1475_v16, %v1196_v35  ;;  %2109 = vmatmul.mubr.msk.f32.gmra.mxu1 %vm1537_vm11, %v1524_v36 }
 0x288   : > { %2085 = vmatmul.mubr.msk.f32.gmra.mxu0 %vm1537_vm11, %v1508_v13 }
 0x29b   : > { %v2095_v32 = vpop.f32.mrf.mxu1 }
 0x29c   : > { %v2071_v50 = vpop.f32.mrf.mxu0  ;;  %v1810_v31 = vadd.f32 %v2095_v32, %v3872_v7 }
 0x29d   : > { %v1730_v19 = vadd.f32 %v2071_v50, %v3872_v7  ;;  %v1804_v39 = vpop.f32.mrf.mxu1 }
 0x29e   : > { %1884 = vst [vmem:[%s3877_s21 + $0xa8] sm:$0xff] %v1810_v31  ;;  %v1724_v20 = vpop.f32.mrf.mxu0  ;;  %v1805_v57 = vadd.f32 %v3872_v7, %v1804_v39 }
 0x29f   : > { %1868 = vst [vmem:[%s3877_s21 + $0x28] sm:$0xff] %v1730_v19  ;;  %v1725_v1 = vadd.f32 %v3872_v7, %v1724_v20 }
 0x2a0   : > { %1883 = vst [vmem:[%s3877_s21 + $0xa0] sm:$0xff] %v1805_v57 }
 0x2a1   : > { %1867 = vst [vmem:[%s3877_s21 + $0x20] sm:$0xff] %v1725_v1 }
 0x2bf   : > { %v2098_v61 = vpop.f32.mrf.mxu1 }
 0x2c0   : > { %v2074_v62 = vpop.f32.mrf.mxu0  ;;  %v1820_v28 = vadd.f32 %v2098_v61, %v3872_v7 }
 0x2c1   : > { %v1740_v33 = vadd.f32 %v2074_v62, %v3872_v7  ;;  %v1814_v22 = vpop.f32.mrf.mxu1 }
 0x2c2   : > { %1886 = vst [vmem:[%s3877_s21 + $0xb8] sm:$0xff] %v1820_v28  ;;  %v1734_v37 = vpop.f32.mrf.mxu0  ;;  %v1815_v42 = vadd.f32 %v3872_v7, %v1814_v22 }
 0x2c3   : > { %1870 = vst [vmem:[%s3877_s21 + $0x38] sm:$0xff] %v1740_v33  ;;  %v1735_v15 = vadd.f32 %v3872_v7, %v1734_v37 }
 0x2c4   : > { %1885 = vst [vmem:[%s3877_s21 + $0xb0] sm:$0xff] %v1815_v42 }
 0x2c5   : > { %1869 = vst [vmem:[%s3877_s21 + $0x30] sm:$0xff] %v1735_v15 }
 0x2e3   : > { %v2101_v21 = vpop.f32.mrf.mxu1 }
 0x2e4   : > { %v2077_v40 = vpop.f32.mrf.mxu0  ;;  %v1830_v29 = vadd.f32 %v2101_v21, %v3872_v7 }
 0x2e5   : > { %v1750_v17 = vadd.f32 %v2077_v40, %v3872_v7  ;;  %v1824_v53 = vpop.f32.mrf.mxu1 }
 0x2e6   : > { %1888 = vst [vmem:[%s3877_s21 + $0xc8] sm:$0xff] %v1830_v29  ;;  %v1744_v48 = vpop.f32.mrf.mxu0  ;;  %v1825_v34 = vadd.f32 %v3872_v7, %v1824_v53 }
 0x2e7   : > { %1872 = vst [vmem:[%s3877_s21 + $0x48] sm:$0xff] %v1750_v17  ;;  %v1745_v5 = vadd.f32 %v3872_v7, %v1744_v48 }
 0x2e8   : > { %1887 = vst [vmem:[%s3877_s21 + $0xc0] sm:$0xff] %v1825_v34 }
 0x2e9   : > { %1871 = vst [vmem:[%s3877_s21 + $0x40] sm:$0xff] %v1745_v5 }
 0x307   : > { %v2104_v18 = vpop.f32.mrf.mxu1 }
 0x308   : > { %v2080_v30 = vpop.f32.mrf.mxu0  ;;  %v1840_v47 = vadd.f32 %v2104_v18, %v3872_v7 }
 0x309   : > { %v1760_v58 = vadd.f32 %v2080_v30, %v3872_v7  ;;  %v1834_v24 = vpop.f32.mrf.mxu1 }
 0x30a   : > { %1890 = vst [vmem:[%s3877_s21 + $0xd8] sm:$0xff] %v1840_v47  ;;  %v1754_v27 = vpop.f32.mrf.mxu0  ;;  %v1835_v8 = vadd.f32 %v3872_v7, %v1834_v24 }
 0x30b   : > { %1874 = vst [vmem:[%s3877_s21 + $0x58] sm:$0xff] %v1760_v58  ;;  %v1755_v10 = vadd.f32 %v3872_v7, %v1754_v27 }
 0x30c   : > { %1889 = vst [vmem:[%s3877_s21 + $0xd0] sm:$0xff] %v1835_v8 }
 0x30d   : > { %1873 = vst [vmem:[%s3877_s21 + $0x50] sm:$0xff] %v1755_v10 }
 0x32b   : > { %v2107_v2 = vpop.f32.mrf.mxu1 }
 0x32c   : > { %v2083_v63 = vpop.f32.mrf.mxu0  ;;  %v1850_v46 = vadd.f32 %v2107_v2, %v3872_v7 }
 0x32d   : > { %v1770_v4 = vadd.f32 %v2083_v63, %v3872_v7  ;;  %v1844_v59 = vpop.f32.mrf.mxu1 }
 0x32e   : > { %1892 = vst [vmem:[%s3877_s21 + $0xe8] sm:$0xff] %v1850_v46  ;;  %v1764_v54 = vpop.f32.mrf.mxu0  ;;  %v1845_v12 = vadd.f32 %v3872_v7, %v1844_v59 }
 0x32f   : > { %1876 = vst [vmem:[%s3877_s21 + $0x68] sm:$0xff] %v1770_v4  ;;  %v1765_v9 = vadd.f32 %v3872_v7, %v1764_v54 }
 0x330   : > { %1891 = vst [vmem:[%s3877_s21 + $0xe0] sm:$0xff] %v1845_v12 }
 0x331   : > { %1875 = vst [vmem:[%s3877_s21 + $0x60] sm:$0xff] %v1765_v9 }
 0x347   : > { %v2110_v3 = vpop.f32.mrf.mxu1 }
 0x348   : > { %v2086_v60 = vpop.f32.mrf.mxu0  ;;  %v1860_v25 = vadd.f32 %v2110_v3, %v3872_v7 }
 0x349   : > { %v1780_v0 = vadd.f32 %v2086_v60, %v3872_v7  ;;  %v1854_v41 = vpop.f32.mrf.mxu1 }
 0x34a   : > { %1894 = vst [vmem:[%s3877_s21 + $0xf8] sm:$0xff] %v1860_v25  ;;  %v1774_v56 = vpop.f32.mrf.mxu0  ;;  %v1855_v6 = vadd.f32 %v3872_v7, %v1854_v41 }
 0x34b   : > { %1878 = vst [vmem:[%s3877_s21 + $0x78] sm:$0xff] %v1780_v0  ;;  %v1775_v51 = vadd.f32 %v3872_v7, %v1774_v56 }
 0x34c   : > { %1893 = vst [vmem:[%s3877_s21 + $0xf0] sm:$0xff] %v1855_v6 }
 0x34d   : > { %1877 = vst [vmem:[%s3877_s21 + $0x70] sm:$0xff] %v1775_v51 }
 0x34e PF: > { %s13_s14 = sadd.s32 1, %s2196_s14   ;;  %s4298_s12 = smov %s2192_s13 }
 0x34f   : > { %p10_p6 = scmp.ge.s32.totalorder %s13_s14, 4   ;;  %s4299_s13 = smov %s4301_s15 }
 0x351   :  { %12 = sbr.rel (!%p10_p6) target bundleno = 2 (0x2), region = 62 }

// kernel: deform_conv2d.3
= control target key start
LH: loop header
LB: loop body
LE: loop exit
PB: predicated region body
PF: predicated region fallthrough
CT: control target
= control target key end

     0   :  { %vm363_vm0 = vcmask 1041408   ;;  %vm266_vm1 = vcmask 293888   ;;  %s1358_s1 = inlined_call_operand.vmem [shape: bf16[36,128], index: 1, kind: input, shape index: {}]   ;;  %s1359_s0 = inlined_call_operand.vmem [shape: bf16[512,36], index: 0, kind: input, shape index: {}]   ;;  %s1360_s2 = inlined_call_operand.vmem [shape: f32[1,128], index: 2, kind: input, shape index: {}]   ;;  %s1361_s3 = inlined_call_operand.vmem [shape: f32[512,128], index: 3, kind: output, shape index: {}]  }
   0x1   :  { %v905_v0 = vld [vmem:[%s1358_s1 + $0x10] ss:$0 sps:$4 sm:$0x33]   ;;  %v906_v1 = vld [vmem:[%s1358_s1 + $0x8] sm:$0xff]   ;;  %v907_v3 = vld [vmem:[%s1358_s1] sm:$0xff]  }
   0x2   :  { %903 = vmatprep.subr.msk.bf16.mxu0 %vm363_vm0, %v905_v0  ;;  %904 = vmatprep.subr.msk.bf16.mxu1 %vm363_vm0, %v905_v0  ;;  %v365_v2 = vsel %vm363_vm0, %v905_v0, 0  ;;  %v908_v4 = vld [vmem:[%s1359_s0] sm:$0xff]   ;;  %v910_v6 = vld [vmem:[%s1359_s0 + $0x8] sm:$0xff]   ;;  %v912_v8 = vld [vmem:[%s1359_s0 + $0x10] sm:$0xff]  }
   0x3   :  { %828 = vmatpush3.bf16.msra.mxu0 %v365_v2  ;;  %900 = vmatpush3.bf16.msra.mxu1 %v365_v2  ;;  %v909_v5 = vld [vmem:[%s1359_s0 + $0x80] sm:$0xff]   ;;  %v911_v7 = vld [vmem:[%s1359_s0 + $0x88] sm:$0xff]   ;;  %v913_v9 = vld [vmem:[%s1359_s0 + $0x90] sm:$0xff]  }
   0x4   :  { %829 = vmatprep.subr.bf16.mxu0 %v906_v1  ;;  %898 = vmatprep.subr.bf16.mxu1 %v906_v1  ;;  %v914_v10 = vld [vmem:[%s1359_s0 + $0x18] sm:$0xff]   ;;  %v916_v12 = vld [vmem:[%s1359_s0 + $0x20] sm:$0xff]   ;;  %v918_v14 = vld [vmem:[%s1359_s0 + $0x28] sm:$0xff]  }
   0x5   :  { %833 = vmatprep.mubr.msk.bf16.mxu0 %vm266_vm1, %v908_v4  ;;  %865 = vmatprep.mubr.msk.bf16.mxu1 %vm266_vm1, %v909_v5  ;;  %v915_v11 = vld [vmem:[%s1359_s0 + $0x98] sm:$0xff]   ;;  %v917_v13 = vld [vmem:[%s1359_s0 + $0xa0] sm:$0xff]   ;;  %v919_v15 = vld [vmem:[%s1359_s0 + $0xa8] sm:$0xff]  }
   0x6   :  { %v920_v16 = vld [vmem:[%s1359_s0 + $0x30] sm:$0xff]   ;;  %v922_v18 = vld [vmem:[%s1359_s0 + $0x38] sm:$0xff]   ;;  %v924_v20 = vld [vmem:[%s1359_s0 + $0x40] sm:$0xff]  }
   0x7   :  { %830 = vmatpush3.bf16.msra.mxu0 %v906_v1  ;;  %901 = vmatpush3.bf16.msra.mxu1 %v906_v1  ;;  %v921_v17 = vld [vmem:[%s1359_s0 + $0xb0] sm:$0xff]   ;;  %v923_v19 = vld [vmem:[%s1359_s0 + $0xb8] sm:$0xff]   ;;  %v925_v21 = vld [vmem:[%s1359_s0 + $0xc0] sm:$0xff]  }
   0x8   :  { %831 = vmatprep.subr.bf16.mxu0 %v907_v3  ;;  %899 = vmatprep.subr.bf16.mxu1 %v907_v3  ;;  %v926_v22 = vld [vmem:[%s1359_s0 + $0x48] sm:$0xff]   ;;  %v928_v24 = vld [vmem:[%s1359_s0 + $0x50] sm:$0xff]   ;;  %v930_v26 = vld [vmem:[%s1359_s0 + $0x58] sm:$0xff]  }
   0x9   :  { %v927_v23 = vld [vmem:[%s1359_s0 + $0xc8] sm:$0xff]   ;;  %v929_v25 = vld [vmem:[%s1359_s0 + $0xd0] sm:$0xff]   ;;  %v931_v27 = vld [vmem:[%s1359_s0 + $0xd8] sm:$0xff]  }
   0xa   :  { %v932_v28 = vld [vmem:[%s1359_s0 + $0x60] sm:$0xff]   ;;  %v934_v30 = vld [vmem:[%s1359_s0 + $0x68] sm:$0xff]   ;;  %v936_v32 = vld [vmem:[%s1359_s0 + $0x70] sm:$0xff]  }
   0xb   :  { %832 = vmatpush3.bf16.msra.mxu0 %v907_v3  ;;  %902 = vmatpush3.bf16.msra.mxu1 %v907_v3  ;;  %v933_v29 = vld [vmem:[%s1359_s0 + $0xe0] sm:$0xff]   ;;  %v935_v31 = vld [vmem:[%s1359_s0 + $0xe8] sm:$0xff]   ;;  %v937_v33 = vld [vmem:[%s1359_s0 + $0xf0] sm:$0xff]  }
   0xc   :  { %v938_v34 = vld [vmem:[%s1359_s0 + $0x78] sm:$0xff]   ;;  %v1100_v36 = vld [vmem:[%s1360_s2] ss:$0 sm:$0xff] }
   0xd   :  { %v939_v35 = vld [vmem:[%s1359_s0 + $0xf8] sm:$0xff]  }
   0xe   :  { %834 = vmatmul.mubr.msk.bf16.vlgmr.msra.gmra.mxu0 %vm266_vm1, %v910_v6  ;;  %866 = vmatmul.mubr.msk.bf16.vlgmr.msra.gmra.mxu1 %vm266_vm1, %v911_v7 }
   0xf   :  { %837 = vmatprep.mubr.msk.bf16.mxu0 %vm266_vm1, %v912_v8  ;;  %869 = vmatprep.mubr.msk.bf16.mxu1 %vm266_vm1, %v913_v9 }
  0x16   :  { %838 = vmatmul.mubr.msk.bf16.gmra.mxu0 %vm266_vm1, %v914_v10  ;;  %870 = vmatmul.mubr.msk.bf16.gmra.mxu1 %vm266_vm1, %v915_v11 }
  0x17   :  { %841 = vmatprep.mubr.msk.bf16.mxu0 %vm266_vm1, %v916_v12  ;;  %873 = vmatprep.mubr.msk.bf16.mxu1 %vm266_vm1, %v917_v13 }
  0x1e   :  { %842 = vmatmul.mubr.msk.bf16.gmra.mxu0 %vm266_vm1, %v918_v14  ;;  %874 = vmatmul.mubr.msk.bf16.gmra.mxu1 %vm266_vm1, %v919_v15 }
  0x1f   :  { %845 = vmatprep.mubr.msk.bf16.mxu0 %vm266_vm1, %v920_v16  ;;  %877 = vmatprep.mubr.msk.bf16.mxu1 %vm266_vm1, %v921_v17 }
  0x26   :  { %846 = vmatmul.mubr.msk.bf16.gmra.mxu0 %vm266_vm1, %v922_v18  ;;  %878 = vmatmul.mubr.msk.bf16.gmra.mxu1 %vm266_vm1, %v923_v19 }
  0x27   :  { %849 = vmatprep.mubr.msk.bf16.mxu0 %vm266_vm1, %v924_v20  ;;  %881 = vmatprep.mubr.msk.bf16.mxu1 %vm266_vm1, %v925_v21 }
  0x2e   :  { %850 = vmatmul.mubr.msk.bf16.gmra.mxu0 %vm266_vm1, %v926_v22  ;;  %882 = vmatmul.mubr.msk.bf16.gmra.mxu1 %vm266_vm1, %v927_v23 }
  0x2f   :  { %853 = vmatprep.mubr.msk.bf16.mxu0 %vm266_vm1, %v928_v24  ;;  %885 = vmatprep.mubr.msk.bf16.mxu1 %vm266_vm1, %v929_v25 }
  0x36   :  { %854 = vmatmul.mubr.msk.bf16.gmra.mxu0 %vm266_vm1, %v930_v26  ;;  %886 = vmatmul.mubr.msk.bf16.gmra.mxu1 %vm266_vm1, %v931_v27 }
  0x37   :  { %857 = vmatprep.mubr.msk.bf16.mxu0 %vm266_vm1, %v932_v28  ;;  %889 = vmatprep.mubr.msk.bf16.mxu1 %vm266_vm1, %v933_v29 }
  0x3e   :  { %858 = vmatmul.mubr.msk.bf16.gmra.mxu0 %vm266_vm1, %v934_v30  ;;  %890 = vmatmul.mubr.msk.bf16.gmra.mxu1 %vm266_vm1, %v935_v31 }
  0x3f   :  { %861 = vmatprep.mubr.msk.bf16.mxu0 %vm266_vm1, %v936_v32  ;;  %893 = vmatprep.mubr.msk.bf16.mxu1 %vm266_vm1, %v937_v33 }
  0x46   :  { %862 = vmatmul.mubr.msk.bf16.gmra.mxu0 %vm266_vm1, %v938_v34  ;;  %894 = vmatmul.mubr.msk.bf16.gmra.mxu1 %vm266_vm1, %v939_v35 }
  0xce   :  { %v835_v37 = vpop.f32.mrf.mxu0  ;;  %v867_v38 = vpop.f32.mrf.mxu1 }
  0xcf   :  { %v410_v39 = vadd.f32 %v835_v37, %v1100_v36  ;;  %v538_v40 = vadd.f32 %v867_v38, %v1100_v36 }
  0xd0   :  { %v401_v41 = vpop.f32.mrf.mxu0  ;;  %v529_v42 = vpop.f32.mrf.mxu1 }
  0xd1   :  { %658 = vst [vmem:[%s1361_s3 + $0x10] sm:$0xff] %v410_v39  ;;  %690 = vst [vmem:[%s1361_s3 + $0x110] sm:$0xff] %v538_v40  ;;  %v402_v43 = vadd.f32 %v1100_v36, %v401_v41  ;;  %v530_v44 = vadd.f32 %v1100_v36, %v529_v42 }
  0xd2   :  { %v836_v45 = vpop.f32.mrf.mxu0  ;;  %v868_v46 = vpop.f32.mrf.mxu1 }
  0xd3   :  { %656 = vst [vmem:[%s1361_s3] sm:$0xff] %v402_v43  ;;  %688 = vst [vmem:[%s1361_s3 + $0x100] sm:$0xff] %v530_v44  ;;  %v413_v47 = vadd.f32 %v836_v45, %v1100_v36  ;;  %v541_v48 = vadd.f32 %v868_v46, %v1100_v36 }
  0xd4   :  { %v404_v49 = vpop.f32.mrf.mxu0  ;;  %v532_v50 = vpop.f32.mrf.mxu1 }
  0xd5   :  { %659 = vst [vmem:[%s1361_s3 + $0x18] sm:$0xff] %v413_v47  ;;  %691 = vst [vmem:[%s1361_s3 + $0x118] sm:$0xff] %v541_v48  ;;  %v405_v51 = vadd.f32 %v1100_v36, %v404_v49  ;;  %v533_v52 = vadd.f32 %v1100_v36, %v532_v50 }
  0xd6   :  { %v839_v53 = vpop.f32.mrf.mxu0  ;;  %v871_v54 = vpop.f32.mrf.mxu1 }
  0xd7   :  { %657 = vst [vmem:[%s1361_s3 + $0x8] sm:$0xff] %v405_v51  ;;  %689 = vst [vmem:[%s1361_s3 + $0x108] sm:$0xff] %v533_v52  ;;  %v426_v55 = vadd.f32 %v839_v53, %v1100_v36  ;;  %v554_v56 = vadd.f32 %v871_v54, %v1100_v36 }
  0xd8   :  { %v417_v57 = vpop.f32.mrf.mxu0  ;;  %v545_v58 = vpop.f32.mrf.mxu1 }
  0xd9   :  { %662 = vst [vmem:[%s1361_s3 + $0x30] sm:$0xff] %v426_v55  ;;  %694 = vst [vmem:[%s1361_s3 + $0x130] sm:$0xff] %v554_v56  ;;  %v418_v59 = vadd.f32 %v1100_v36, %v417_v57  ;;  %v546_v60 = vadd.f32 %v1100_v36, %v545_v58 }
  0xda   :  { %v840_v61 = vpop.f32.mrf.mxu0  ;;  %v872_v62 = vpop.f32.mrf.mxu1 }
  0xdb   :  { %660 = vst [vmem:[%s1361_s3 + $0x20] sm:$0xff] %v418_v59  ;;  %692 = vst [vmem:[%s1361_s3 + $0x120] sm:$0xff] %v546_v60  ;;  %v429_v63 = vadd.f32 %v840_v61, %v1100_v36  ;;  %v557_v0 = vadd.f32 %v872_v62, %v1100_v36 }
  0xdc   :  { %v420_v1 = vpop.f32.mrf.mxu0  ;;  %v548_v2 = vpop.f32.mrf.mxu1 }
  0xdd   :  { %663 = vst [vmem:[%s1361_s3 + $0x38] sm:$0xff] %v429_v63  ;;  %695 = vst [vmem:[%s1361_s3 + $0x138] sm:$0xff] %v557_v0  ;;  %v421_v3 = vadd.f32 %v1100_v36, %v420_v1  ;;  %v549_v4 = vadd.f32 %v1100_v36, %v548_v2 }
  0xde   :  { %v843_v5 = vpop.f32.mrf.mxu0  ;;  %v875_v6 = vpop.f32.mrf.mxu1 }
  0xdf   :  { %661 = vst [vmem:[%s1361_s3 + $0x28] sm:$0xff] %v421_v3  ;;  %693 = vst [vmem:[%s1361_s3 + $0x128] sm:$0xff] %v549_v4  ;;  %v442_v7 = vadd.f32 %v843_v5, %v1100_v36  ;;  %v570_v8 = vadd.f32 %v875_v6, %v1100_v36 }
  0xe0   :  { %v433_v9 = vpop.f32.mrf.mxu0  ;;  %v561_v10 = vpop.f32.mrf.mxu1 }
  0xe1   :  { %666 = vst [vmem:[%s1361_s3 + $0x50] sm:$0xff] %v442_v7  ;;  %698 = vst [vmem:[%s1361_s3 + $0x150] sm:$0xff] %v570_v8  ;;  %v434_v11 = vadd.f32 %v1100_v36, %v433_v9  ;;  %v562_v12 = vadd.f32 %v1100_v36, %v561_v10 }
  0xe2   :  { %v844_v13 = vpop.f32.mrf.mxu0  ;;  %v876_v14 = vpop.f32.mrf.mxu1 }
  0xe3   :  { %664 = vst [vmem:[%s1361_s3 + $0x40] sm:$0xff] %v434_v11  ;;  %696 = vst [vmem:[%s1361_s3 + $0x140] sm:$0xff] %v562_v12  ;;  %v445_v15 = vadd.f32 %v844_v13, %v1100_v36  ;;  %v573_v16 = vadd.f32 %v876_v14, %v1100_v36 }
  0xe4   :  { %v436_v17 = vpop.f32.mrf.mxu0  ;;  %v564_v18 = vpop.f32.mrf.mxu1 }
  0xe5   :  { %667 = vst [vmem:[%s1361_s3 + $0x58] sm:$0xff] %v445_v15  ;;  %699 = vst [vmem:[%s1361_s3 + $0x158] sm:$0xff] %v573_v16  ;;  %v437_v19 = vadd.f32 %v1100_v36, %v436_v17  ;;  %v565_v20 = vadd.f32 %v1100_v36, %v564_v18 }
  0xe6   :  { %v847_v21 = vpop.f32.mrf.mxu0  ;;  %v879_v22 = vpop.f32.mrf.mxu1 }
  0xe7   :  { %665 = vst [vmem:[%s1361_s3 + $0x48] sm:$0xff] %v437_v19  ;;  %697 = vst [vmem:[%s1361_s3 + $0x148] sm:$0xff] %v565_v20  ;;  %v458_v23 = vadd.f32 %v847_v21, %v1100_v36  ;;  %v586_v24 = vadd.f32 %v879_v22, %v1100_v36 }
  0xe8   :  { %v449_v25 = vpop.f32.mrf.mxu0  ;;  %v577_v26 = vpop.f32.mrf.mxu1 }
  0xe9   :  { %670 = vst [vmem:[%s1361_s3 + $0x70] sm:$0xff] %v458_v23  ;;  %702 = vst [vmem:[%s1361_s3 + $0x170] sm:$0xff] %v586_v24  ;;  %v450_v27 = vadd.f32 %v1100_v36, %v449_v25  ;;  %v578_v28 = vadd.f32 %v1100_v36, %v577_v26 }
  0xea   :  { %v848_v29 = vpop.f32.mrf.mxu0  ;;  %v880_v30 = vpop.f32.mrf.mxu1 }
  0xeb   :  { %668 = vst [vmem:[%s1361_s3 + $0x60] sm:$0xff] %v450_v27  ;;  %700 = vst [vmem:[%s1361_s3 + $0x160] sm:$0xff] %v578_v28  ;;  %v461_v31 = vadd.f32 %v848_v29, %v1100_v36  ;;  %v589_v32 = vadd.f32 %v880_v30, %v1100_v36 }
  0xec   :  { %v452_v33 = vpop.f32.mrf.mxu0  ;;  %v580_v34 = vpop.f32.mrf.mxu1 }
  0xed   :  { %671 = vst [vmem:[%s1361_s3 + $0x78] sm:$0xff] %v461_v31  ;;  %703 = vst [vmem:[%s1361_s3 + $0x178] sm:$0xff] %v589_v32  ;;  %v453_v35 = vadd.f32 %v1100_v36, %v452_v33  ;;  %v581_v37 = vadd.f32 %v1100_v36, %v580_v34 }
  0xee   :  { %v851_v38 = vpop.f32.mrf.mxu0  ;;  %v883_v39 = vpop.f32.mrf.mxu1 }
  0xef   :  { %669 = vst [vmem:[%s1361_s3 + $0x68] sm:$0xff] %v453_v35  ;;  %701 = vst [vmem:[%s1361_s3 + $0x168] sm:$0xff] %v581_v37  ;;  %v474_v40 = vadd.f32 %v851_v38, %v1100_v36  ;;  %v602_v41 = vadd.f32 %v883_v39, %v1100_v36 }
  0xf0   :  { %v465_v42 = vpop.f32.mrf.mxu0  ;;  %v593_v43 = vpop.f32.mrf.mxu1 }
  0xf1   :  { %674 = vst [vmem:[%s1361_s3 + $0x90] sm:$0xff] %v474_v40  ;;  %706 = vst [vmem:[%s1361_s3 + $0x190] sm:$0xff] %v602_v41  ;;  %v466_v44 = vadd.f32 %v1100_v36, %v465_v42  ;;  %v594_v45 = vadd.f32 %v1100_v36, %v593_v43 }
  0xf2   :  { %v852_v46 = vpop.f32.mrf.mxu0  ;;  %v884_v47 = vpop.f32.mrf.mxu1 }
  0xf3   :  { %672 = vst [vmem:[%s1361_s3 + $0x80] sm:$0xff] %v466_v44  ;;  %704 = vst [vmem:[%s1361_s3 + $0x180] sm:$0xff] %v594_v45  ;;  %v477_v48 = vadd.f32 %v852_v46, %v1100_v36  ;;  %v605_v49 = vadd.f32 %v884_v47, %v1100_v36 }
  0xf4   :  { %v468_v50 = vpop.f32.mrf.mxu0  ;;  %v596_v51 = vpop.f32.mrf.mxu1 }
  0xf5   :  { %675 = vst [vmem:[%s1361_s3 + $0x98] sm:$0xff] %v477_v48  ;;  %707 = vst [vmem:[%s1361_s3 + $0x198] sm:$0xff] %v605_v49  ;;  %v469_v52 = vadd.f32 %v1100_v36, %v468_v50  ;;  %v597_v53 = vadd.f32 %v1100_v36, %v596_v51 }
  0xf6   :  { %v855_v54 = vpop.f32.mrf.mxu0  ;;  %v887_v55 = vpop.f32.mrf.mxu1 }
  0xf7   :  { %673 = vst [vmem:[%s1361_s3 + $0x88] sm:$0xff] %v469_v52  ;;  %705 = vst [vmem:[%s1361_s3 + $0x188] sm:$0xff] %v597_v53  ;;  %v490_v56 = vadd.f32 %v855_v54, %v1100_v36  ;;  %v618_v57 = vadd.f32 %v887_v55, %v1100_v36 }
  0xf8   :  { %v481_v58 = vpop.f32.mrf.mxu0  ;;  %v609_v59 = vpop.f32.mrf.mxu1 }
  0xf9   :  { %678 = vst [vmem:[%s1361_s3 + $0xb0] sm:$0xff] %v490_v56  ;;  %710 = vst [vmem:[%s1361_s3 + $0x1b0] sm:$0xff] %v618_v57  ;;  %v482_v60 = vadd.f32 %v1100_v36, %v481_v58  ;;  %v610_v61 = vadd.f32 %v1100_v36, %v609_v59 }
  0xfa   :  { %v856_v62 = vpop.f32.mrf.mxu0  ;;  %v888_v63 = vpop.f32.mrf.mxu1 }
  0xfb   :  { %676 = vst [vmem:[%s1361_s3 + $0xa0] sm:$0xff] %v482_v60  ;;  %708 = vst [vmem:[%s1361_s3 + $0x1a0] sm:$0xff] %v610_v61  ;;  %v493_v0 = vadd.f32 %v856_v62, %v1100_v36  ;;  %v621_v1 = vadd.f32 %v888_v63, %v1100_v36 }
  0xfc   :  { %v484_v2 = vpop.f32.mrf.mxu0  ;;  %v612_v3 = vpop.f32.mrf.mxu1 }
  0xfd   :  { %679 = vst [vmem:[%s1361_s3 + $0xb8] sm:$0xff] %v493_v0  ;;  %711 = vst [vmem:[%s1361_s3 + $0x1b8] sm:$0xff] %v621_v1  ;;  %v485_v4 = vadd.f32 %v1100_v36, %v484_v2  ;;  %v613_v5 = vadd.f32 %v1100_v36, %v612_v3 }
  0xfe   :  { %v859_v6 = vpop.f32.mrf.mxu0  ;;  %v891_v7 = vpop.f32.mrf.mxu1 }
  0xff   :  { %677 = vst [vmem:[%s1361_s3 + $0xa8] sm:$0xff] %v485_v4  ;;  %709 = vst [vmem:[%s1361_s3 + $0x1a8] sm:$0xff] %v613_v5  ;;  %v506_v8 = vadd.f32 %v859_v6, %v1100_v36  ;;  %v634_v9 = vadd.f32 %v891_v7, %v1100_v36 }
 0x100   :  { %v497_v10 = vpop.f32.mrf.mxu0  ;;  %v625_v11 = vpop.f32.mrf.mxu1 }
 0x101   :  { %682 = vst [vmem:[%s1361_s3 + $0xd0] sm:$0xff] %v506_v8  ;;  %714 = vst [vmem:[%s1361_s3 + $0x1d0] sm:$0xff] %v634_v9  ;;  %v498_v12 = vadd.f32 %v1100_v36, %v497_v10  ;;  %v626_v13 = vadd.f32 %v1100_v36, %v625_v11 }
 0x102   :  { %v860_v14 = vpop.f32.mrf.mxu0  ;;  %v892_v15 = vpop.f32.mrf.mxu1 }
 0x103   :  { %680 = vst [vmem:[%s1361_s3 + $0xc0] sm:$0xff] %v498_v12  ;;  %712 = vst [vmem:[%s1361_s3 + $0x1c0] sm:$0xff] %v626_v13  ;;  %v509_v16 = vadd.f32 %v860_v14, %v1100_v36  ;;  %v637_v17 = vadd.f32 %v892_v15, %v1100_v36 }
 0x104   :  { %v500_v18 = vpop.f32.mrf.mxu0  ;;  %v628_v19 = vpop.f32.mrf.mxu1 }
 0x105   :  { %683 = vst [vmem:[%s1361_s3 + $0xd8] sm:$0xff] %v509_v16  ;;  %715 = vst [vmem:[%s1361_s3 + $0x1d8] sm:$0xff] %v637_v17  ;;  %v501_v20 = vadd.f32 %v1100_v36, %v500_v18  ;;  %v629_v21 = vadd.f32 %v1100_v36, %v628_v19 }
 0x106   :  { %v863_v22 = vpop.f32.mrf.mxu0  ;;  %v895_v23 = vpop.f32.mrf.mxu1 }
 0x107   :  { %681 = vst [vmem:[%s1361_s3 + $0xc8] sm:$0xff] %v501_v20  ;;  %713 = vst [vmem:[%s1361_s3 + $0x1c8] sm:$0xff] %v629_v21  ;;  %v522_v24 = vadd.f32 %v863_v22, %v1100_v36  ;;  %v650_v25 = vadd.f32 %v895_v23, %v1100_v36 }
 0x108   :  { %v513_v26 = vpop.f32.mrf.mxu0  ;;  %v641_v27 = vpop.f32.mrf.mxu1 }
 0x109   :  { %686 = vst [vmem:[%s1361_s3 + $0xf0] sm:$0xff] %v522_v24  ;;  %718 = vst [vmem:[%s1361_s3 + $0x1f0] sm:$0xff] %v650_v25  ;;  %v514_v28 = vadd.f32 %v1100_v36, %v513_v26  ;;  %v642_v29 = vadd.f32 %v1100_v36, %v641_v27 }
 0x10a   :  { %v864_v30 = vpop.f32.mrf.mxu0  ;;  %v896_v31 = vpop.f32.mrf.mxu1 }
 0x10b   :  { %684 = vst [vmem:[%s1361_s3 + $0xe0] sm:$0xff] %v514_v28  ;;  %716 = vst [vmem:[%s1361_s3 + $0x1e0] sm:$0xff] %v642_v29  ;;  %v525_v32 = vadd.f32 %v864_v30, %v1100_v36  ;;  %v653_v33 = vadd.f32 %v896_v31, %v1100_v36 }
 0x10c   :  { %v516_v34 = vpop.f32.mrf.mxu0  ;;  %v644_v35 = vpop.f32.mrf.mxu1 }
 0x10d   :  { %687 = vst [vmem:[%s1361_s3 + $0xf8] sm:$0xff] %v525_v32  ;;  %719 = vst [vmem:[%s1361_s3 + $0x1f8] sm:$0xff] %v653_v33  ;;  %v517_v37 = vadd.f32 %v1100_v36, %v516_v34  ;;  %v645_v38 = vadd.f32 %v1100_v36, %v644_v35 }
 0x10f   :  { %685 = vst [vmem:[%s1361_s3 + $0xe8] sm:$0xff] %v517_v37  ;;  %717 = vst [vmem:[%s1361_s3 + $0x1e8] sm:$0xff] %v645_v38 }

</bundles_post_ra>
